<compile_context>
chip_gen: v7x
topology: tpu7x:2x2x1
jax: 0.10.0
libtpu: 0.0.40
codegen_flags: <defaults>
</compile_context>

<pallas_src>
import functools
import math

import jax
import jax.numpy as jnp
from jax.experimental import pallas as pl
from jax.experimental.pallas import tpu as pltpu

# ------------------------- sizes / hyper-parameters --------------------------
RATIO = 0.5          # SAModule ratio
RADIUS = 0.75        # SAModule r
K_NEIGH = 64         # max_num_neighbors in radius()
CIN = 4              # input feature channels
F_IN = CIN + 3       # local_nn input = concat(x_j, pos_j - pos_i)
F_PAD = 8            # F_IN zero-padded to 8 for packing / aligned MXU contraction
H1 = 64              # local_nn hidden width   (nn ~ MLP([Cin+3, 64, 128]))
H2 = 128             # local_nn output width
TM_DEFAULT = 128     # centers processed per Pallas grid step (raise to 256 on v5e/v6e)


def _round_up(x, m):
    return ((x + m - 1) // m) * m


# --------------------------- Pallas kernel (hot path) ------------------------
def sa_conv_kernel(feat_ref, w1_ref, b1_ref, w2_ref, b2_ref, out_ref):
    # feat_ref: (TM*K, F_PAD) bf16   grouped edge features for TM centers
    # w1/w2   : bf16 weights; b1/b2: f32 biases
    # out_ref : (TM, H2) f32         max-aggregated PointNetConv output
    tm = out_ref.shape[0]
    f = feat_ref[...]
    h1 = jnp.dot(f, w1_ref[...], preferred_element_type=jnp.float32)
    h1 = jnp.maximum(h1 + b1_ref[...], 0.0)                       # f32 elementwise
    h2 = jnp.dot(h1.astype(jnp.bfloat16), w2_ref[...],
                 preferred_element_type=jnp.float32)
    h2 = jnp.maximum(h2 + b2_ref[...], 0.0)                       # (TM*K, H2) f32, >= 0
    # 'max' aggregation over the K neighbor slots of each center.  No mask needed:
    # invalid slots were remapped upstream to the always-present self-edge.
    out_ref[...] = jnp.max(h2.reshape(tm, K_NEIGH, H2), axis=1)


def pointnet_conv_pallas(feats, w1, b1, w2, b2, *, tm=TM_DEFAULT):
    """feats: (M, K_NEIGH, F_PAD) bf16 grouped edge features -> (M, H2) f32."""
    m_centers = feats.shape[0]
    tm = min(tm, _round_up(max(m_centers, 8), 8))
    # Pad centers so the grid divides exactly; keep the grid even whenever it has more than
    # one step so both v7x TensorCores are used under the "parallel" dimension semantics.
    pad_mult = tm if m_centers <= tm else 2 * tm
    m_pad = _round_up(m_centers, pad_mult)
    if m_pad != m_centers:
        feats = jnp.pad(feats, ((0, m_pad - m_centers), (0, 0), (0, 0)))
    feats_flat = feats.reshape(m_pad * K_NEIGH, F_PAD)

    w1p = jnp.pad(w1, ((0, F_PAD - w1.shape[0]), (0, 0))).astype(jnp.bfloat16)
    w2b = w2.astype(jnp.bfloat16)

    out = pl.pallas_call(
        sa_conv_kernel,
        out_shape=jax.ShapeDtypeStruct((m_pad, H2), jnp.float32),
        grid=(m_pad // tm,),
        in_specs=[
            pl.BlockSpec((tm * K_NEIGH, F_PAD), lambda i: (i, 0)),
            pl.BlockSpec((F_PAD, H1), lambda i: (0, 0)),
            pl.BlockSpec((1, H1), lambda i: (0, 0)),
            pl.BlockSpec((H1, H2), lambda i: (0, 0)),
            pl.BlockSpec((1, H2), lambda i: (0, 0)),
        ],
        out_specs=pl.BlockSpec((tm, H2), lambda i: (i, 0)),
        compiler_params=pltpu.CompilerParams(
            dimension_semantics=("parallel",),
            vmem_limit_bytes=48 * 1024 * 1024,   # intermediates ~8 MiB at TM=128; << v7x 64 MiB
        ),
    )(feats_flat, w1p, b1, w2b, b2)
    return out[:m_centers]


# ------------------------------- JAX glue ------------------------------------
def _fps_one_graph(pos_b, m):
    """Farthest point sampling on one graph; deterministic start at index 0."""
    d0 = jnp.sum((pos_b - pos_b[0]) ** 2, axis=-1)
    sel0 = jnp.zeros((m,), jnp.int32)

    def body(i, state):
        sel, d = state
        nxt = jnp.argmax(d).astype(jnp.int32)
        sel = sel.at[i].set(nxt)
        d = jnp.minimum(d, jnp.sum((pos_b - pos_b[nxt]) ** 2, axis=-1))
        return sel, d

    sel, _ = jax.lax.fori_loop(1, m, body, (sel0, d0))
    return sel


def _radius_group(pos, batch, centers_idx, r, k):
    """For each center: up to k in-radius, same-batch neighbor indices (index order).

    Invalid / padded slots are remapped to the center's own index; since the self-edge is
    always a genuine radius edge, duplicating it does not change max-aggregation, so no
    neighbor mask has to be shipped to the kernel.
    """
    n = pos.shape[0]
    arange = jnp.arange(n, dtype=jnp.int32)

    def per_center(ci):
        d2 = jnp.sum((pos - pos[ci]) ** 2, axis=-1)
        valid = (d2 <= r * r) & (batch == batch[ci])
        key = jnp.where(valid, arange, arange + n)       # valid points first, index order
        order = jnp.argsort(key).astype(jnp.int32)
        vsort = valid[order]
        if k > n:
            pad = k - n
            order = jnp.concatenate([order, jnp.full((pad,), ci, jnp.int32)])
            vsort = jnp.concatenate([vsort, jnp.zeros((pad,), bool)])
        order = order[:k]
        vsort = vsort[:k]
        return jnp.where(vsort, order, ci)

    return jax.vmap(per_center)(centers_idx)


def _group_edge_features(x, pos, batch, *, num_graphs, n_per_graph, ratio, r):
    m_per = int(math.ceil(ratio * n_per_graph))
    pos_g = pos.reshape(num_graphs, n_per_graph, 3)
    sel_local = jax.vmap(lambda pb: _fps_one_graph(pb, m_per))(pos_g)      # (G, m_per)
    offsets = (jnp.arange(num_graphs, dtype=jnp.int32) * n_per_graph)[:, None]
    idx = (sel_local + offsets).reshape(-1)                                # (M,)

    nbr_idx = _radius_group(pos, batch, idx, r, K_NEIGH)                   # (M, K) int32

    x_j = x[nbr_idx]                                                       # (M, K, Cin)
    rel = pos[nbr_idx] - pos[idx][:, None, :]                              # (M, K, 3)
    pad = jnp.zeros((idx.shape[0], K_NEIGH, F_PAD - F_IN), jnp.float32)
    feats = jnp.concatenate([x_j, rel, pad], axis=-1)                      # (M, K, F_PAD)
    # bf16 grouped features: native MXU dtype, half the HBM bytes for the round trip.
    return feats.astype(jnp.bfloat16), idx


def sa_module_forward(x, pos, batch, params, *, num_graphs, n_per_graph,
                      ratio=RATIO, r=RADIUS):
    feats, idx = _group_edge_features(
        x, pos, batch, num_graphs=num_graphs, n_per_graph=n_per_graph, ratio=ratio, r=r)
    out = pointnet_conv_pallas(feats, *params)
    return out, pos[idx], batch[idx]


# TODO(synk): torch_cluster's fps uses a random start point and radius() returns a ragged
# edge list; here FPS starts at node 0 and each center keeps its first 64 in-radius
# neighbors in index order (fixed-size grouping) — same semantics up to those
# implementation-defined choices.
# TODO(synk): the grouped edge features are still materialized in HBM by the XLA gather;
# fusing that gather into the kernel (pl.ANY inputs + scalar-prefetched nbr_idx + in-kernel
# DMA gather) would remove the extra HBM round trip.


# --------------------------------- main --------------------------------------
if __name__ == "__main__":
    NUM_GRAPHS = 2
    N_PER = 16
    N = NUM_GRAPHS * N_PER

    key = jax.random.PRNGKey(0)
    kx, kp, k1, k2, k3, k4 = jax.random.split(key, 6)
    x = jax.random.normal(kx, (N, CIN), jnp.float32)
    pos = jax.random.uniform(kp, (N, 3), jnp.float32)
    batch = jnp.repeat(jnp.arange(NUM_GRAPHS, dtype=jnp.int32), N_PER)

    # local_nn parameters (Linear->ReLU->Linear->ReLU), deterministic init
    w1 = 0.2 * jax.random.normal(k1, (F_IN, H1), jnp.float32)
    b1 = 0.05 * jax.random.normal(k2, (1, H1), jnp.float32)
    w2 = 0.2 * jax.random.normal(k3, (H1, H2), jnp.float32)
    b2 = 0.05 * jax.random.normal(k4, (1, H2), jnp.float32)
    params = (w1, b1, w2, b2)

    fwd = jax.jit(functools.partial(sa_module_forward,
                                    num_graphs=NUM_GRAPHS, n_per_graph=N_PER))
    out_x, out_pos, out_batch = fwd(x, pos, batch, params)
    jax.block_until_ready((out_x, out_pos, out_batch))

    # pure-JAX reference emulating the kernel's bf16-operand / f32-accumulate numerics
    feats, idx = _group_edge_features(
        x, pos, batch, num_graphs=NUM_GRAPHS, n_per_graph=N_PER, ratio=RATIO, r=RADIUS)
    m = idx.shape[0]
    f_r = feats.astype(jnp.float32).reshape(m * K_NEIGH, F_PAD)
    w1r = jnp.pad(w1, ((0, F_PAD - F_IN), (0, 0))).astype(jnp.bfloat16).astype(jnp.float32)
    w2r = w2.astype(jnp.bfloat16).astype(jnp.float32)
    h = jnp.maximum(f_r @ w1r + b1, 0.0)
    h = h.astype(jnp.bfloat16).astype(jnp.float32)
    h = jnp.maximum(h @ w2r + b2, 0.0)
    ref = jnp.max(h.reshape(m, K_NEIGH, H2), axis=1)

    assert out_x.shape == (m, H2)
    assert out_pos.shape == (m, 3)
    assert out_batch.shape == (m,)
    assert jnp.allclose(out_x, ref, atol=2e-3, rtol=2e-3)
    assert jnp.array_equal(out_pos, pos[idx])
    assert jnp.array_equal(out_batch, batch[idx])
    print("KERNEL_OK")
</pallas_src>

<mosaic_0001>
module attributes {stable_mosaic.version = 11 : i64} {
  func.func @sa_conv_kernel(%arg0: i32, %arg1: memref<1024x8xbf16, #tpu.memory_space<vmem>>, %arg2: memref<8x64xbf16, #tpu.memory_space<vmem>>, %arg3: memref<1x64xf32, #tpu.memory_space<vmem>>, %arg4: memref<64x128xbf16, #tpu.memory_space<vmem>>, %arg5: memref<1x128xf32, #tpu.memory_space<vmem>>, %arg6: memref<16x128xf32, #tpu.memory_space<vmem>>) attributes {dimension_semantics = [#tpu.dimension_semantics<parallel>], iteration_bounds = array<i64: 1>, scalar_prefetch = 0 : i64, scratch_operands = 0 : i64, tpu.core_type = #tpu.core_type<tc>, window_params = [{transform_indices = @transform_0, window_bounds = array<i64: 1024, 8>}, {pipeline_mode = #tpu.pipeline_mode<synchronous>, transform_indices = @transform_1, window_bounds = array<i64: 8, 64>}, {pipeline_mode = #tpu.pipeline_mode<synchronous>, transform_indices = @transform_2, window_bounds = array<i64: 1, 64>}, {pipeline_mode = #tpu.pipeline_mode<synchronous>, transform_indices = @transform_3, window_bounds = array<i64: 64, 128>}, {pipeline_mode = #tpu.pipeline_mode<synchronous>, transform_indices = @transform_4, window_bounds = array<i64: 1, 128>}, {transform_indices = @transform_5, window_bounds = array<i64: 16, 128>}]} {
    %c0 = arith.constant 0 : index
    %c0_0 = arith.constant 0 : index
    %0 = vector.load %arg1[%c0, %c0_0] : memref<1024x8xbf16, #tpu.memory_space<vmem>>, vector<1024x8xbf16>
    %c0_1 = arith.constant 0 : index
    %c0_2 = arith.constant 0 : index
    %1 = vector.load %arg2[%c0_1, %c0_2] : memref<8x64xbf16, #tpu.memory_space<vmem>>, vector<8x64xbf16>
    %cst = arith.constant dense<0.000000e+00> : vector<1024x64xf32>
    %2 = tpu.matmul %0, %1, %cst {dimension_numbers = #tpu.dot_dimension_numbers<[1], [0], [0], [1], [0, 0, 1, 1], [], []>} : vector<1024x8xbf16>, vector<8x64xbf16>, vector<1024x64xf32> -> vector<1024x64xf32>
    %c0_3 = arith.constant 0 : index
    %c0_4 = arith.constant 0 : index
    %3 = vector.load %arg3[%c0_3, %c0_4] : memref<1x64xf32, #tpu.memory_space<vmem>>, vector<1x64xf32>
    %4 = vector.broadcast %3 : vector<1x64xf32> to vector<1024x64xf32>
    %5 = arith.addf %2, %4 : vector<1024x64xf32>
    %cst_5 = arith.constant 0.000000e+00 : f32
    %6 = vector.broadcast %cst_5 : f32 to vector<1024x64xf32>
    %7 = arith.maximumf %5, %6 : vector<1024x64xf32>
    %8 = arith.truncf %7 : vector<1024x64xf32> to vector<1024x64xbf16>
    %c0_6 = arith.constant 0 : index
    %c0_7 = arith.constant 0 : index
    %9 = vector.load %arg4[%c0_6, %c0_7] : memref<64x128xbf16, #tpu.memory_space<vmem>>, vector<64x128xbf16>
    %cst_8 = arith.constant dense<0.000000e+00> : vector<1024x128xf32>
    %10 = tpu.matmul %8, %9, %cst_8 {dimension_numbers = #tpu.dot_dimension_numbers<[1], [0], [0], [1], [0, 0, 1, 1], [], []>} : vector<1024x64xbf16>, vector<64x128xbf16>, vector<1024x128xf32> -> vector<1024x128xf32>
    %c0_9 = arith.constant 0 : index
    %c0_10 = arith.constant 0 : index
    %11 = vector.load %arg5[%c0_9, %c0_10] : memref<1x128xf32, #tpu.memory_space<vmem>>, vector<1x128xf32>
    %12 = vector.broadcast %11 : vector<1x128xf32> to vector<1024x128xf32>
    %13 = arith.addf %10, %12 : vector<1024x128xf32>
    %cst_11 = arith.constant 0.000000e+00 : f32
    %14 = vector.broadcast %cst_11 : f32 to vector<1024x128xf32>
    %15 = arith.maximumf %13, %14 : vector<1024x128xf32>
    %16 = vector.shape_cast %15 : vector<1024x128xf32> to vector<16x64x128xf32>
    %cst_12 = arith.constant dense<0xFF800000> : vector<16x128xf32>
    %17 = vector.multi_reduction <maximumf>, %16, %cst_12 [1] : vector<16x64x128xf32> to vector<16x128xf32>
    %c0_13 = arith.constant 0 : index
    %c0_14 = arith.constant 0 : index
    %18 = vector.load %arg6[%c0_13, %c0_14] : memref<16x128xf32, #tpu.memory_space<vmem>>, vector<16x128xf32>
    tpu.vector_store %arg6[%c0_13, %c0_14], %17 {strides = array<i32>} : memref<16x128xf32, #tpu.memory_space<vmem>>, vector<16x128xf32>,
    return
  }
  func.func @transform_0(%arg0: i32) -> (i32, i32) {
    %c0_i32 = arith.constant 0 : i32
    %c0_i32_0 = arith.constant 0 : i32
    return %arg0, %c0_i32 : i32, i32
  }
  func.func @transform_1(%arg0: i32) -> (i32, i32) {
    %c0_i32 = arith.constant 0 : i32
    %c0_i32_0 = arith.constant 0 : i32
    %c0_i32_1 = arith.constant 0 : i32
    return %c0_i32, %c0_i32_0 : i32, i32
  }
  func.func @transform_2(%arg0: i32) -> (i32, i32) {
    %c0_i32 = arith.constant 0 : i32
    %c0_i32_0 = arith.constant 0 : i32
    %c0_i32_1 = arith.constant 0 : i32
    return %c0_i32, %c0_i32_0 : i32, i32
  }
  func.func @transform_3(%arg0: i32) -> (i32, i32) {
    %c0_i32 = arith.constant 0 : i32
    %c0_i32_0 = arith.constant 0 : i32
    %c0_i32_1 = arith.constant 0 : i32
    return %c0_i32, %c0_i32_0 : i32, i32
  }
  func.func @transform_4(%arg0: i32) -> (i32, i32) {
    %c0_i32 = arith.constant 0 : i32
    %c0_i32_0 = arith.constant 0 : i32
    %c0_i32_1 = arith.constant 0 : i32
    return %c0_i32, %c0_i32_0 : i32, i32
  }
  func.func @transform_5(%arg0: i32) -> (i32, i32) {
    %c0_i32 = arith.constant 0 : i32
    %c0_i32_0 = arith.constant 0 : i32
    return %arg0, %c0_i32 : i32, i32
  }
}

</mosaic_0001>

<bundles_post_ra>
// kernel: sa_module_forward.1
= control target key start
LH: loop header
LB: loop body
LE: loop exit
PB: predicated region body
PF: predicated region fallthrough
CT: control target
= control target key end

     0   :  { %vm671_vm0 = vcmask 1043456   ;;  %vm478_vm1 = vcmask 64512   ;;  %s3947_s0 = inlined_call_operand.vmem [shape: bf16[1024,8], index: 0, kind: input, shape index: {}]   ;;  %s3948_s1 = inlined_call_operand.vmem [shape: bf16[8,64], index: 1, kind: input, shape index: {}]   ;;  %s3949_s2 = inlined_call_operand.vmem [shape: f32[1,64], index: 2, kind: input, shape index: {}]   ;;  %s3950_s3 = inlined_call_operand.vmem [shape: bf16[64,128], index: 3, kind: input, shape index: {}]   ;;  %s3951_s4 = inlined_call_operand.vmem [shape: f32[1,128], index: 4, kind: input, shape index: {}]   ;;  %s3952_s5 = inlined_call_operand.hbm [shape: f32[16,128], index: 5, kind: output, shape index: {}]  }
   0x1   :  { %v150_v0 = vld [vmem:[%s3948_s1] sm:$0xf]  ;;  %v3184_v3 = vld [vmem:[%s3947_s0 + $0x8] sm:$0xff]   ;;  %v3185_v4 = vld [vmem:[%s3947_s0 + $0x10] sm:$0xff]  }
   0x2   :  { %v3183_v1 = vld [vmem:[%s3947_s0] sm:$0xff]   ;;  %3179 = vmatprep.subr.msk.bf16.mxu0 %vm671_vm0, %v150_v0  ;;  %v673_v2 = vsel %vm671_vm0, %v150_v0, 0  ;;  %v3186_v5 = vld [vmem:[%s3947_s0 + $0x18] sm:$0xff]   ;;  %v3188_v7 = vld [vmem:[%s3947_s0 + $0x28] sm:$0xff]  }
   0x3   :  { %2914 = vmatpush3.bf16.msra.mxu0 %v673_v2  ;;  %2915 = vmatprep.mubr.msk.bf16.mxu0 %vm478_vm1, %v3183_v1  ;;  %v3187_v6 = vld [vmem:[%s3947_s0 + $0x20] sm:$0xff]   ;;  %v3189_v8 = vld [vmem:[%s3947_s0 + $0x30] sm:$0xff]   ;;  %v3190_v9 = vld [vmem:[%s3947_s0 + $0x38] sm:$0xff]  }
   0x4   :  { %v3191_v10 = vld [vmem:[%s3947_s0 + $0x40] sm:$0xff]   ;;  %v3192_v11 = vld [vmem:[%s3947_s0 + $0x48] sm:$0xff]   ;;  %v3193_v12 = vld [vmem:[%s3947_s0 + $0x50] sm:$0xff]  }
   0x5   :  { %v3194_v13 = vld [vmem:[%s3947_s0 + $0x58] sm:$0xff]   ;;  %v3195_v14 = vld [vmem:[%s3947_s0 + $0x60] sm:$0xff]   ;;  %v3196_v15 = vld [vmem:[%s3947_s0 + $0x68] sm:$0xff]  }
   0x6   :  { %2916 = vmatmul.mubr.msk.bf16.vlgmr.msra.gmra.mrb[0].mxu0 %vm478_vm1, %v3184_v3  ;;  %v3197_v16 = vld [vmem:[%s3947_s0 + $0x70] sm:$0xff]   ;;  %v3198_v17 = vld [vmem:[%s3947_s0 + $0x78] sm:$0xff]   ;;  %v3199_v18 = vld [vmem:[%s3947_s0 + $0x80] sm:$0xff]  }
   0x7   :  { %2919 = vmatprep.mubr.msk.bf16.mxu0 %vm478_vm1, %v3185_v4 }
   0xe   :  { %2920 = vmatmul.mubr.msk.bf16.gmra.mrb[4].mxu0 %vm478_vm1, %v3186_v5 }
   0xf   :  { %2923 = vmatprep.mubr.msk.bf16.mxu0 %vm478_vm1, %v3187_v6 }
  0x16   :  { %2924 = vmatmul.mubr.msk.bf16.gmra.mrb[8].mxu0 %vm478_vm1, %v3188_v7 }
  0x17   :  { %2927 = vmatprep.mubr.msk.bf16.mxu0 %vm478_vm1, %v3189_v8 }
  0x1e   :  { %2928 = vmatmul.mubr.msk.bf16.gmra.mrb[12].mxu0 %vm478_vm1, %v3190_v9 }
  0x1f   :  { %2931 = vmatprep.mubr.msk.bf16.mxu0 %vm478_vm1, %v3191_v10 }
  0x26   :  { %2932 = vmatmul.mubr.msk.bf16.gmra.mrb[16].mxu0 %vm478_vm1, %v3192_v11 }
  0x27   :  { %2935 = vmatprep.mubr.msk.bf16.mxu0 %vm478_vm1, %v3193_v12 }
  0x2e   :  { %2936 = vmatmul.mubr.msk.bf16.gmra.mrb[20].mxu0 %vm478_vm1, %v3194_v13 }
  0x2f   :  { %2939 = vmatprep.mubr.msk.bf16.mxu0 %vm478_vm1, %v3195_v14 }
  0x36   :  { %2940 = vmatmul.mubr.msk.bf16.gmra.mrb[24].mxu0 %vm478_vm1, %v3196_v15 }
  0x37   :  { %2943 = vmatprep.mubr.msk.bf16.mxu0 %vm478_vm1, %v3197_v16 }
  0x3e   :  { %2944 = vmatmul.mubr.msk.bf16.gmra.mrb[28].mxu0 %vm478_vm1, %v3198_v17 }
  0x3f   :  { %2947 = vmatprep.mubr.msk.bf16.mxu0 %vm478_vm1, %v3199_v18 }
  0x40   :  { %10 = vsyncpa [#allocation3], 0  ;;  %v3200_v19 = vld [vmem:[%s3947_s0 + $0x88] sm:$0xff]   ;;  %v3201_v20 = vld [vmem:[%s3947_s0 + $0x90] sm:$0xff]   ;;  %vm1451_vm2 = vcmask 523264   ;;  %vm2541_vm3 = vcmask 1041409  }
  0x41   :  { %v3202_v21 = vld [vmem:[%s3947_s0 + $0x98] sm:$0xff]   ;;  %v3203_v22 = vld [vmem:[%s3947_s0 + $0xa0] sm:$0xff]   ;;  %v3204_v24 = vld [vmem:[%s3947_s0 + $0xa8] sm:$0xff]   ;;  %vm2543_vm4 = vcmask 1042434   ;;  %vm2545_vm5 = vcmask 1043459   ;;  %vm2547_vm6 = vcmask 1044484  }
  0x42   :  { %v3235_v23 = vld [vmem:[%s3950_s3] sm:$0xff]   ;;  %v3205_v25 = vld [vmem:[%s3947_s0 + $0xb0] sm:$0xff]   ;;  %v3238_v26 = vld [vmem:[%s3950_s3 + $0x8] sm:$0xff]   ;;  %vm2549_vm7 = vcmask 1045509   ;;  %vm2551_vm8 = vcmask 1046534   ;;  %vm2553_vm9 = vcmask 1047559  }
  0x43   :  { %3043 = vmatprep.subr.bf16.mxu1 %v3235_v23  ;;  %v3206_v27 = vld [vmem:[%s3947_s0 + $0xb8] sm:$0xff]   ;;  %v3239_v28 = vld [vmem:[%s3950_s3 + $0x10] sm:$0xff]   ;;  %v3207_v29 = vld [vmem:[%s3947_s0 + $0xc0] sm:$0xff]  }
  0x44   :  { %3044 = vmatpush3.bf16.msra.mxu1 %v3235_v23  ;;  %v3242_v30 = vld [vmem:[%s3950_s3 + $0x18] sm:$0xff]   ;;  %v3208_v31 = vld [vmem:[%s3947_s0 + $0xc8] sm:$0xff]   ;;  %v3209_v32 = vld [vmem:[%s3947_s0 + $0xd0] sm:$0xff]  }
  0x45   :  { %3045 = vmatprep.subr.bf16.mxu1 %v3238_v26  ;;  %v3210_v33 = vld [vmem:[%s3947_s0 + $0xd8] sm:$0xff]   ;;  %v3211_v34 = vld [vmem:[%s3947_s0 + $0xe0] sm:$0xff]   ;;  %v3212_v35 = vld [vmem:[%s3947_s0 + $0xe8] sm:$0xff]  }
  0x46   :  { %2948 = vmatmul.mubr.msk.bf16.gmra.mrb[32].mxu0 %vm478_vm1, %v3200_v19  ;;  %v3213_v36 = vld [vmem:[%s3947_s0 + $0xf0] sm:$0xff]   ;;  %v3214_v37 = vld [vmem:[%s3947_s0 + $0xf8] sm:$0xff]   ;;  %v3215_v38 = vld [vmem:[%s3947_s0 + $0x100] sm:$0xff]  }
  0x47   :  { %2951 = vmatprep.mubr.msk.bf16.mxu0 %vm478_vm1, %v3201_v20  ;;  %v3216_v39 = vld [vmem:[%s3947_s0 + $0x108] sm:$0xff]   ;;  %v3217_v40 = vld [vmem:[%s3947_s0 + $0x110] sm:$0xff]   ;;  %v3218_v41 = vld [vmem:[%s3947_s0 + $0x118] sm:$0xff]  }
  0x48   :  { %3046 = vmatpush3.bf16.msra.mxu1 %v3238_v26  ;;  %v3219_v42 = vld [vmem:[%s3947_s0 + $0x120] sm:$0xff]   ;;  %v3220_v43 = vld [vmem:[%s3947_s0 + $0x128] sm:$0xff]   ;;  %v3221_v44 = vld [vmem:[%s3947_s0 + $0x130] sm:$0xff]  }
  0x49   :  { %3047 = vmatprep.subr.bf16.mxu1 %v3239_v28  ;;  %v3222_v45 = vld [vmem:[%s3947_s0 + $0x138] sm:$0xff]   ;;  %v3223_v46 = vld [vmem:[%s3947_s0 + $0x140] sm:$0xff]   ;;  %v3224_v47 = vld [vmem:[%s3947_s0 + $0x148] sm:$0xff]  }
  0x4a   :  { %v3225_v48 = vld [vmem:[%s3947_s0 + $0x150] sm:$0xff]   ;;  %v3226_v49 = vld [vmem:[%s3947_s0 + $0x158] sm:$0xff]   ;;  %v3227_v50 = vld [vmem:[%s3947_s0 + $0x160] sm:$0xff]  }
  0x4b   :  { %v3228_v51 = vld [vmem:[%s3947_s0 + $0x168] sm:$0xff]   ;;  %v3229_v52 = vld [vmem:[%s3947_s0 + $0x170] sm:$0xff]   ;;  %v3230_v53 = vld [vmem:[%s3947_s0 + $0x178] sm:$0xff]  }
  0x4c   :  { %3048 = vmatpush3.bf16.msra.mxu1 %v3239_v28  ;;  %v3231_v54 = vld [vmem:[%s3947_s0 + $0x180] sm:$0xff]   ;;  %v3232_v55 = vld [vmem:[%s3947_s0 + $0x188] sm:$0xff]   ;;  %v3233_v56 = vld [vmem:[%s3947_s0 + $0x190] sm:$0xff]  }
  0x4d   :  { %3049 = vmatprep.subr.bf16.mxu1 %v3242_v30  ;;  %v3234_v57 = vld [vmem:[%s3947_s0 + $0x198] sm:$0xff]   ;;  %v3236_v58 = vld [vmem:[%s3947_s0 + $0x1a0] sm:$0xff]   ;;  %v3237_v59 = vld [vmem:[%s3947_s0 + $0x1a8] sm:$0xff]  }
  0x4e   :  { %2952 = vmatmul.mubr.msk.bf16.gmra.mrb[36].mxu0 %vm478_vm1, %v3202_v21  ;;  %v3240_v60 = vld [vmem:[%s3947_s0 + $0x1b0] sm:$0xff]   ;;  %v3547_v61 = vld [vmem:[%s3949_s2] ss:$0 sm:$0xff]  ;;  %v3241_v1 = vld [vmem:[%s3947_s0 + $0x1b8] sm:$0xff]  }
  0x4f   :  { %2955 = vmatprep.mubr.msk.bf16.mxu0 %vm478_vm1, %v3203_v22  ;;  %v3243_v4 = vld [vmem:[%s3947_s0 + $0x1c0] sm:$0xff]   ;;  %v3244_v17 = vld [vmem:[%s3947_s0 + $0x1c8] sm:$0xff]   ;;  %v3245_v20 = vld [vmem:[%s3947_s0 + $0x1d0] sm:$0xff]  }
  0x50   :  { %3050 = vmatpush3.bf16.msra.mxu1 %v3242_v30 }
  0x56   :  { %2956 = vmatmul.mubr.msk.bf16.gmra.mrb[40].mxu0 %vm478_vm1, %v3204_v24 }
  0x57   :  { %2959 = vmatprep.mubr.msk.bf16.mxu0 %vm478_vm1, %v3205_v25 }
  0x5e   :  { %2960 = vmatmul.mubr.msk.bf16.gmra.mrb[44].mxu0 %vm478_vm1, %v3206_v27 }
  0x5f   :  { %2963 = vmatprep.mubr.msk.bf16.mxu0 %vm478_vm1, %v3207_v29 }
  0x66   :  { %2964 = vmatmul.mubr.msk.bf16.gmra.mrb[48].mxu0 %vm478_vm1, %v3208_v31 }
  0x67   :  { %2967 = vmatprep.mubr.msk.bf16.mxu0 %vm478_vm1, %v3209_v32 }
  0x6e   :  { %2968 = vmatmul.mubr.msk.bf16.gmra.mrb[52].mxu0 %vm478_vm1, %v3210_v33  ;;  %v3246_v33 = vld [vmem:[%s3947_s0 + $0x1d8] sm:$0xff]  }
  0x6f   :  { %2971 = vmatprep.mubr.msk.bf16.mxu0 %vm478_vm1, %v3211_v34 }
  0x76   :  { %2972 = vmatmul.mubr.msk.bf16.gmra.mrb[56].mxu0 %vm478_vm1, %v3212_v35 }
  0x77   :  { %2975 = vmatprep.mubr.msk.bf16.mxu0 %vm478_vm1, %v3213_v36  ;;  %v3247_v36 = vld [vmem:[%s3947_s0 + $0x1e0] sm:$0xff]  }
  0x7e   :  { %2976 = vmatmul.mubr.msk.bf16.gmra.mrb[60].mxu0 %vm478_vm1, %v3214_v37 }
  0x7f   :  { %2979 = vmatprep.mubr.msk.bf16.mxu0 %vm478_vm1, %v3215_v38 }
  0x86   :  { %2980 = vmatmul.mubr.msk.bf16.gmra.mrb[64].mxu0 %vm478_vm1, %v3216_v39 }
  0x87   :  { %2983 = vmatprep.mubr.msk.bf16.mxu0 %vm478_vm1, %v3217_v40 }
  0x8e   :  { %2984 = vmatmul.mubr.msk.bf16.gmra.mrb[68].mxu0 %vm478_vm1, %v3218_v41 }
  0x8f   :  { %2987 = vmatprep.mubr.msk.bf16.mxu0 %vm478_vm1, %v3219_v42 }
  0x96   :  { %2988 = vmatmul.mubr.msk.bf16.gmra.mrb[72].mxu0 %vm478_vm1, %v3220_v43 }
  0x97   :  { %2991 = vmatprep.mubr.msk.bf16.mxu0 %vm478_vm1, %v3221_v44 }
  0x9e   :  { %2992 = vmatmul.mubr.msk.bf16.gmra.mrb[76].mxu0 %vm478_vm1, %v3222_v45 }
  0x9f   :  { %2995 = vmatprep.mubr.msk.bf16.mxu0 %vm478_vm1, %v3223_v46 }
  0xa6   :  { %2996 = vmatmul.mubr.msk.bf16.gmra.mrb[80].mxu0 %vm478_vm1, %v3224_v47 }
  0xa7   :  { %2999 = vmatprep.mubr.msk.bf16.mxu0 %vm478_vm1, %v3225_v48 }
  0xae   :  { %3000 = vmatmul.mubr.msk.bf16.gmra.mrb[84].mxu0 %vm478_vm1, %v3226_v49  ;;  %v3248_v49 = vld [vmem:[%s3947_s0 + $0x1e8] sm:$0xff]  }
  0xaf   :  { %3003 = vmatprep.mubr.msk.bf16.mxu0 %vm478_vm1, %v3227_v50 }
  0xb6   :  { %3004 = vmatmul.mubr.msk.bf16.gmra.mrb[88].mxu0 %vm478_vm1, %v3228_v51 }
  0xb7   :  { %3007 = vmatprep.mubr.msk.bf16.mxu0 %vm478_vm1, %v3229_v52  ;;  %v3249_v52 = vld [vmem:[%s3947_s0 + $0x1f0] sm:$0xff]  }
  0xbe   :  { %3008 = vmatmul.mubr.msk.bf16.gmra.mrb[92].mxu0 %vm478_vm1, %v3230_v53 }
  0xbf   :  { %3011 = vmatprep.mubr.msk.bf16.mxu0 %vm478_vm1, %v3231_v54 }
  0xc6   :  { %3012 = vmatmul.mubr.msk.bf16.gmra.mrb[96].mxu0 %vm478_vm1, %v3232_v55 }
  0xc7   :  { %3015 = vmatprep.mubr.msk.bf16.mxu0 %vm478_vm1, %v3233_v56 }
  0xce   :  { %3016 = vmatmul.mubr.msk.bf16.gmra.mrb[100].mxu0 %vm478_vm1, %v3234_v57 }
  0xcf   :  { %3019 = vmatprep.mubr.msk.bf16.mxu0 %vm478_vm1, %v3236_v58 }
  0xd6   :  { %3020 = vmatmul.mubr.msk.bf16.gmra.mrb[104].mxu0 %vm478_vm1, %v3237_v59 }
  0xd7   :  { %3023 = vmatprep.mubr.msk.bf16.mxu0 %vm478_vm1, %v3240_v60 }
  0xd9   :  { %v2917_v62 = vpop.f32.mrb[0].mxu0 }
  0xda   :  { %v718_v63 = vadd.f32 %v2917_v62, %v3547_v61  ;;  %v709_v0 = vpop.f32.mrb[1].mxu0 }
  0xdb   :  { %v710_v2 = vadd.f32 %v3547_v61, %v709_v0  ;;  %v2918_v3 = vpop.f32.mrb[2].mxu0 }
  0xdc   :  { %v721_v5 = vadd.f32 %v2918_v3, %v3547_v61  ;;  %v712_v6 = vpop.f32.mrb[3].mxu0  ;;  %v1222_v8 = vmax.f32 %v718_v63, 0.0 }
  0xdd   :  { %v713_v7 = vadd.f32 %v3547_v61, %v712_v6  ;;  %v1220_v10 = vmax.f32 %v710_v2, 0.0  ;;  %v3250_v2 = vld [vmem:[%s3947_s0 + $0x1f8] sm:$0xff]  }
  0xde   :  { %v1223_v9 = vmax.f32 %v721_v5, 0.0  ;;  %3024 = vmatmul.mubr.msk.bf16.gmra.mrb[108].mxu0 %vm478_vm1, %v3241_v1 }
  0xdf   :  { %v1221_v11 = vmax.f32 %v713_v7, 0.0  ;;  %3027 = vmatprep.mubr.msk.bf16.mxu0 %vm478_vm1, %v3243_v4 }
  0xe0   :  { %v1349_v12 = vpack.c.bf16 %v1223_v9, %v1222_v8 }
  0xe1   :  { %v2921_v13 = vpop.f32.mrb[4].mxu0  ;;  %v1348_v14 = vpack.c.bf16 %v1221_v11, %v1220_v10 }
  0xe2   :  { %v734_v15 = vadd.f32 %v2921_v13, %v3547_v61  ;;  %v725_v16 = vpop.f32.mrb[5].mxu0 }
  0xe3   :  { %v726_v18 = vadd.f32 %v3547_v61, %v725_v16  ;;  %v2922_v19 = vpop.f32.mrb[6].mxu0  ;;  %3051 = vmatprep.mubr.msk.bf16.mxu1 %vm1451_vm2, %v1348_v14 }
  0xe4   :  { %v737_v21 = vadd.f32 %v2922_v19, %v3547_v61  ;;  %v728_v22 = vpop.f32.mrb[7].mxu0  ;;  %3052 = vmatmul.mubr.msk.bf16.vlgmr.msra.gmra.mrb[0].mxu1 %vm1451_vm2, %v1349_v12  ;;  %v1226_v24 = vmax.f32 %v734_v15, 0.0 }
  0xe5   :  { %v729_v23 = vadd.f32 %v3547_v61, %v728_v22  ;;  %v1224_v26 = vmax.f32 %v726_v18, 0.0 }
  0xe6   :  { %v1227_v25 = vmax.f32 %v737_v21, 0.0  ;;  %3028 = vmatmul.mubr.msk.bf16.gmra.mrb[112].mxu0 %vm478_vm1, %v3244_v17 }
  0xe7   :  { %v1225_v27 = vmax.f32 %v729_v23, 0.0  ;;  %3031 = vmatprep.mubr.msk.bf16.mxu0 %vm478_vm1, %v3245_v20 }
  0xe8   :  { %v1351_v28 = vpack.c.bf16 %v1227_v25, %v1226_v24 }
  0xe9   :  { %v1350_v29 = vpack.c.bf16 %v1225_v27, %v1224_v26  ;;  %v2925_v30 = vpop.f32.mrb[8].mxu0 }
  0xea   :  { %v750_v31 = vadd.f32 %v2925_v30, %v3547_v61  ;;  %v741_v32 = vpop.f32.mrb[9].mxu0 }
  0xeb   :  { %v742_v34 = vadd.f32 %v3547_v61, %v741_v32  ;;  %v2926_v35 = vpop.f32.mrb[10].mxu0  ;;  %3055 = vmatprep.mubr.msk.bf16.mxu1 %vm1451_vm2, %v1350_v29 }
  0xec   :  { %v753_v37 = vadd.f32 %v2926_v35, %v3547_v61  ;;  %v744_v38 = vpop.f32.mrb[11].mxu0  ;;  %3056 = vmatmul.mubr.msk.bf16.gmra.mrb[4].mxu1 %vm1451_vm2, %v1351_v28  ;;  %v1230_v40 = vmax.f32 %v750_v31, 0.0 }
  0xed   :  { %v745_v39 = vadd.f32 %v3547_v61, %v744_v38  ;;  %v1228_v42 = vmax.f32 %v742_v34, 0.0 }
  0xee   :  { %v1231_v41 = vmax.f32 %v753_v37, 0.0  ;;  %3032 = vmatmul.mubr.msk.bf16.gmra.mrb[116].mxu0 %vm478_vm1, %v3246_v33 }
  0xef   :  { %v1229_v43 = vmax.f32 %v745_v39, 0.0  ;;  %3035 = vmatprep.mubr.msk.bf16.mxu0 %vm478_vm1, %v3247_v36 }
  0xf0   :  { %v1353_v44 = vpack.c.bf16 %v1231_v41, %v1230_v40 }
  0xf1   :  { %v1352_v45 = vpack.c.bf16 %v1229_v43, %v1228_v42  ;;  %v2929_v46 = vpop.f32.mrb[12].mxu0 }
  0xf2   :  { %v766_v47 = vadd.f32 %v2929_v46, %v3547_v61  ;;  %v757_v48 = vpop.f32.mrb[13].mxu0 }
  0xf3   :  { %v758_v50 = vadd.f32 %v3547_v61, %v757_v48  ;;  %v2930_v51 = vpop.f32.mrb[14].mxu0  ;;  %3059 = vmatprep.mubr.msk.bf16.mxu1 %vm1451_vm2, %v1352_v45 }
  0xf4   :  { %v769_v53 = vadd.f32 %v2930_v51, %v3547_v61  ;;  %v760_v54 = vpop.f32.mrb[15].mxu0  ;;  %3060 = vmatmul.mubr.msk.bf16.gmra.mrb[8].mxu1 %vm1451_vm2, %v1353_v44  ;;  %v1234_v56 = vmax.f32 %v766_v47, 0.0 }
  0xf5   :  { %v761_v55 = vadd.f32 %v3547_v61, %v760_v54  ;;  %v1232_v58 = vmax.f32 %v758_v50, 0.0 }
  0xf6   :  { %v1235_v57 = vmax.f32 %v769_v53, 0.0  ;;  %3036 = vmatmul.mubr.msk.bf16.gmra.mrb[120].mxu0 %vm478_vm1, %v3248_v49 }
  0xf7   :  { %v1233_v59 = vmax.f32 %v761_v55, 0.0  ;;  %3039 = vmatprep.mubr.msk.bf16.mxu0 %vm478_vm1, %v3249_v52 }
  0xf8   :  { %v1355_v60 = vpack.c.bf16 %v1235_v57, %v1234_v56 }
  0xf9   :  { %v1354_v62 = vpack.c.bf16 %v1233_v59, %v1232_v58  ;;  %v2933_v63 = vpop.f32.mrb[16].mxu0 }
  0xfa   :  { %v782_v0 = vadd.f32 %v2933_v63, %v3547_v61  ;;  %v773_v1 = vpop.f32.mrb[17].mxu0 }
  0xfb   :  { %v774_v3 = vadd.f32 %v3547_v61, %v773_v1  ;;  %v2934_v4 = vpop.f32.mrb[18].mxu0  ;;  %3063 = vmatprep.mubr.msk.bf16.mxu1 %vm1451_vm2, %v1354_v62 }
  0xfc   :  { %v785_v5 = vadd.f32 %v2934_v4, %v3547_v61  ;;  %v776_v6 = vpop.f32.mrb[19].mxu0  ;;  %3064 = vmatmul.mubr.msk.bf16.gmra.mrb[12].mxu1 %vm1451_vm2, %v1355_v60  ;;  %v1238_v8 = vmax.f32 %v782_v0, 0.0 }
  0xfd   :  { %v777_v7 = vadd.f32 %v3547_v61, %v776_v6  ;;  %v1236_v10 = vmax.f32 %v774_v3, 0.0 }
  0xfe   :  { %v1239_v9 = vmax.f32 %v785_v5, 0.0  ;;  %3040 = vmatmul.mubr.msk.bf16.gmra.mrb[124].mxu0 %vm478_vm1, %v3250_v2 }
  0xff   :  { %v1237_v11 = vmax.f32 %v777_v7, 0.0 }
 0x100   :  { %v1357_v12 = vpack.c.bf16 %v1239_v9, %v1238_v8 }
 0x101   :  { %v1356_v13 = vpack.c.bf16 %v1237_v11, %v1236_v10  ;;  %v2937_v14 = vpop.f32.mrb[20].mxu0 }
 0x102   :  { %v798_v15 = vadd.f32 %v2937_v14, %v3547_v61  ;;  %v789_v16 = vpop.f32.mrb[21].mxu0 }
 0x103   :  { %v790_v17 = vadd.f32 %v3547_v61, %v789_v16  ;;  %v2938_v18 = vpop.f32.mrb[22].mxu0  ;;  %3067 = vmatprep.mubr.msk.bf16.mxu1 %vm1451_vm2, %v1356_v13 }
 0x104   :  { %v801_v19 = vadd.f32 %v2938_v18, %v3547_v61  ;;  %v792_v20 = vpop.f32.mrb[23].mxu0  ;;  %3068 = vmatmul.mubr.msk.bf16.gmra.mrb[16].mxu1 %vm1451_vm2, %v1357_v12  ;;  %v1242_v22 = vmax.f32 %v798_v15, 0.0 }
 0x105   :  { %v793_v21 = vadd.f32 %v3547_v61, %v792_v20  ;;  %v1240_v24 = vmax.f32 %v790_v17, 0.0 }
 0x106   :  { %v1243_v23 = vmax.f32 %v801_v19, 0.0 }
 0x107   :  { %v1241_v25 = vmax.f32 %v793_v21, 0.0 }
 0x108   :  { %v1359_v26 = vpack.c.bf16 %v1243_v23, %v1242_v22 }
 0x109   :  { %v1358_v27 = vpack.c.bf16 %v1241_v25, %v1240_v24  ;;  %v2941_v28 = vpop.f32.mrb[24].mxu0 }
 0x10a   :  { %v814_v29 = vadd.f32 %v2941_v28, %v3547_v61  ;;  %v805_v30 = vpop.f32.mrb[25].mxu0 }
 0x10b   :  { %v806_v31 = vadd.f32 %v3547_v61, %v805_v30  ;;  %v2942_v32 = vpop.f32.mrb[26].mxu0  ;;  %3071 = vmatprep.mubr.msk.bf16.mxu1 %vm1451_vm2, %v1358_v27 }
 0x10c   :  { %v817_v33 = vadd.f32 %v2942_v32, %v3547_v61  ;;  %v808_v34 = vpop.f32.mrb[27].mxu0  ;;  %3072 = vmatmul.mubr.msk.bf16.gmra.mrb[20].mxu1 %vm1451_vm2, %v1359_v26  ;;  %v1246_v36 = vmax.f32 %v814_v29, 0.0 }
 0x10d   :  { %v809_v35 = vadd.f32 %v3547_v61, %v808_v34  ;;  %v1244_v38 = vmax.f32 %v806_v31, 0.0 }
 0x10e   :  { %v1247_v37 = vmax.f32 %v817_v33, 0.0 }
 0x10f   :  { %v1245_v39 = vmax.f32 %v809_v35, 0.0 }
 0x110   :  { %v1361_v40 = vpack.c.bf16 %v1247_v37, %v1246_v36 }
 0x111   :  { %v1360_v41 = vpack.c.bf16 %v1245_v39, %v1244_v38  ;;  %v2945_v42 = vpop.f32.mrb[28].mxu0 }
 0x112   :  { %v830_v43 = vadd.f32 %v2945_v42, %v3547_v61  ;;  %v821_v44 = vpop.f32.mrb[29].mxu0 }
 0x113   :  { %v822_v45 = vadd.f32 %v3547_v61, %v821_v44  ;;  %v2946_v46 = vpop.f32.mrb[30].mxu0  ;;  %3075 = vmatprep.mubr.msk.bf16.mxu1 %vm1451_vm2, %v1360_v41 }
 0x114   :  { %v833_v47 = vadd.f32 %v2946_v46, %v3547_v61  ;;  %v824_v48 = vpop.f32.mrb[31].mxu0  ;;  %3076 = vmatmul.mubr.msk.bf16.gmra.mrb[24].mxu1 %vm1451_vm2, %v1361_v40  ;;  %v1250_v50 = vmax.f32 %v830_v43, 0.0 }
 0x115   :  { %v825_v49 = vadd.f32 %v3547_v61, %v824_v48  ;;  %v1248_v52 = vmax.f32 %v822_v45, 0.0 }
 0x116   :  { %v1251_v51 = vmax.f32 %v833_v47, 0.0 }
 0x117   :  { %v1249_v53 = vmax.f32 %v825_v49, 0.0 }
 0x118   :  { %v1363_v54 = vpack.c.bf16 %v1251_v51, %v1250_v50 }
 0x119   :  { %v1362_v55 = vpack.c.bf16 %v1249_v53, %v1248_v52  ;;  %v2949_v56 = vpop.f32.mrb[32].mxu0 }
 0x11a   :  { %v846_v57 = vadd.f32 %v2949_v56, %v3547_v61  ;;  %v837_v58 = vpop.f32.mrb[33].mxu0 }
 0x11b   :  { %v838_v59 = vadd.f32 %v3547_v61, %v837_v58  ;;  %v2950_v60 = vpop.f32.mrb[34].mxu0  ;;  %3079 = vmatprep.mubr.msk.bf16.mxu1 %vm1451_vm2, %v1362_v55 }
 0x11c   :  { %v849_v62 = vadd.f32 %v2950_v60, %v3547_v61  ;;  %v840_v63 = vpop.f32.mrb[35].mxu0  ;;  %3080 = vmatmul.mubr.msk.bf16.gmra.mrb[28].mxu1 %vm1451_vm2, %v1363_v54  ;;  %v1254_v1 = vmax.f32 %v846_v57, 0.0 }
 0x11d   :  { %v841_v0 = vadd.f32 %v3547_v61, %v840_v63  ;;  %v1252_v3 = vmax.f32 %v838_v59, 0.0 }
 0x11e   :  { %v1255_v2 = vmax.f32 %v849_v62, 0.0 }
 0x11f   :  { %v1253_v4 = vmax.f32 %v841_v0, 0.0 }
 0x120   :  { %v1365_v5 = vpack.c.bf16 %v1255_v2, %v1254_v1 }
 0x121   :  { %v1364_v6 = vpack.c.bf16 %v1253_v4, %v1252_v3  ;;  %v2953_v7 = vpop.f32.mrb[36].mxu0 }
 0x122   :  { %v862_v8 = vadd.f32 %v2953_v7, %v3547_v61  ;;  %v853_v9 = vpop.f32.mrb[37].mxu0 }
 0x123   :  { %v854_v10 = vadd.f32 %v3547_v61, %v853_v9  ;;  %v2954_v11 = vpop.f32.mrb[38].mxu0  ;;  %3083 = vmatprep.mubr.msk.bf16.mxu1 %vm1451_vm2, %v1364_v6 }
 0x124   :  { %v865_v12 = vadd.f32 %v2954_v11, %v3547_v61  ;;  %v856_v13 = vpop.f32.mrb[39].mxu0  ;;  %3084 = vmatmul.mubr.msk.bf16.gmra.mrb[32].mxu1 %vm1451_vm2, %v1365_v5  ;;  %v1258_v15 = vmax.f32 %v862_v8, 0.0 }
 0x125   :  { %v857_v14 = vadd.f32 %v3547_v61, %v856_v13  ;;  %v1256_v17 = vmax.f32 %v854_v10, 0.0 }
 0x126   :  { %v1259_v16 = vmax.f32 %v865_v12, 0.0 }
 0x127   :  { %v1257_v18 = vmax.f32 %v857_v14, 0.0 }
 0x128   :  { %v1367_v19 = vpack.c.bf16 %v1259_v16, %v1258_v15 }
 0x129   :  { %v1366_v20 = vpack.c.bf16 %v1257_v18, %v1256_v17  ;;  %v2957_v21 = vpop.f32.mrb[40].mxu0 }
 0x12a   :  { %v878_v22 = vadd.f32 %v2957_v21, %v3547_v61  ;;  %v869_v23 = vpop.f32.mrb[41].mxu0 }
 0x12b   :  { %v870_v24 = vadd.f32 %v3547_v61, %v869_v23  ;;  %v2958_v25 = vpop.f32.mrb[42].mxu0  ;;  %3087 = vmatprep.mubr.msk.bf16.mxu1 %vm1451_vm2, %v1366_v20 }
 0x12c   :  { %v881_v26 = vadd.f32 %v2958_v25, %v3547_v61  ;;  %v872_v27 = vpop.f32.mrb[43].mxu0  ;;  %3088 = vmatmul.mubr.msk.bf16.gmra.mrb[36].mxu1 %vm1451_vm2, %v1367_v19  ;;  %v1262_v29 = vmax.f32 %v878_v22, 0.0 }
 0x12d   :  { %v873_v28 = vadd.f32 %v3547_v61, %v872_v27  ;;  %v1260_v31 = vmax.f32 %v870_v24, 0.0 }
 0x12e   :  { %v1263_v30 = vmax.f32 %v881_v26, 0.0 }
 0x12f   :  { %v1261_v32 = vmax.f32 %v873_v28, 0.0 }
 0x130   :  { %v1369_v33 = vpack.c.bf16 %v1263_v30, %v1262_v29 }
 0x131   :  { %v1368_v34 = vpack.c.bf16 %v1261_v32, %v1260_v31  ;;  %v2961_v35 = vpop.f32.mrb[44].mxu0 }
 0x132   :  { %v894_v36 = vadd.f32 %v2961_v35, %v3547_v61  ;;  %v885_v37 = vpop.f32.mrb[45].mxu0 }
 0x133   :  { %v886_v38 = vadd.f32 %v3547_v61, %v885_v37  ;;  %v2962_v39 = vpop.f32.mrb[46].mxu0  ;;  %3091 = vmatprep.mubr.msk.bf16.mxu1 %vm1451_vm2, %v1368_v34 }
 0x134   :  { %v897_v40 = vadd.f32 %v2962_v39, %v3547_v61  ;;  %v888_v41 = vpop.f32.mrb[47].mxu0  ;;  %3092 = vmatmul.mubr.msk.bf16.gmra.mrb[40].mxu1 %vm1451_vm2, %v1369_v33  ;;  %v1266_v43 = vmax.f32 %v894_v36, 0.0 }
 0x135   :  { %v889_v42 = vadd.f32 %v3547_v61, %v888_v41  ;;  %v1264_v45 = vmax.f32 %v886_v38, 0.0 }
 0x136   :  { %v1267_v44 = vmax.f32 %v897_v40, 0.0 }
 0x137   :  { %v1265_v46 = vmax.f32 %v889_v42, 0.0 }
 0x138   :  { %v1371_v47 = vpack.c.bf16 %v1267_v44, %v1266_v43 }
 0x139   :  { %v1370_v48 = vpack.c.bf16 %v1265_v46, %v1264_v45  ;;  %v2965_v49 = vpop.f32.mrb[48].mxu0 }
 0x13a   :  { %v910_v50 = vadd.f32 %v2965_v49, %v3547_v61  ;;  %v901_v51 = vpop.f32.mrb[49].mxu0 }
 0x13b   :  { %v902_v52 = vadd.f32 %v3547_v61, %v901_v51  ;;  %v2966_v53 = vpop.f32.mrb[50].mxu0  ;;  %3095 = vmatprep.mubr.msk.bf16.mxu1 %vm1451_vm2, %v1370_v48 }
 0x13c   :  { %v913_v54 = vadd.f32 %v2966_v53, %v3547_v61  ;;  %v904_v55 = vpop.f32.mrb[51].mxu0  ;;  %3096 = vmatmul.mubr.msk.bf16.gmra.mrb[44].mxu1 %vm1451_vm2, %v1371_v47  ;;  %v1270_v57 = vmax.f32 %v910_v50, 0.0 }
 0x13d   :  { %v905_v56 = vadd.f32 %v3547_v61, %v904_v55  ;;  %v1268_v59 = vmax.f32 %v902_v52, 0.0 }
 0x13e   :  { %v1271_v58 = vmax.f32 %v913_v54, 0.0 }
 0x13f   :  { %v1269_v60 = vmax.f32 %v905_v56, 0.0 }
 0x140   :  { %v1373_v62 = vpack.c.bf16 %v1271_v58, %v1270_v57 }
 0x141   :  { %v1372_v63 = vpack.c.bf16 %v1269_v60, %v1268_v59  ;;  %v2969_v0 = vpop.f32.mrb[52].mxu0 }
 0x142   :  { %v926_v1 = vadd.f32 %v2969_v0, %v3547_v61  ;;  %v917_v2 = vpop.f32.mrb[53].mxu0 }
 0x143   :  { %v918_v3 = vadd.f32 %v3547_v61, %v917_v2  ;;  %v2970_v4 = vpop.f32.mrb[54].mxu0  ;;  %3099 = vmatprep.mubr.msk.bf16.mxu1 %vm1451_vm2, %v1372_v63 }
 0x144   :  { %v929_v5 = vadd.f32 %v2970_v4, %v3547_v61  ;;  %v920_v6 = vpop.f32.mrb[55].mxu0  ;;  %3100 = vmatmul.mubr.msk.bf16.gmra.mrb[48].mxu1 %vm1451_vm2, %v1373_v62  ;;  %v1274_v8 = vmax.f32 %v926_v1, 0.0 }
 0x145   :  { %v921_v7 = vadd.f32 %v3547_v61, %v920_v6  ;;  %v1272_v10 = vmax.f32 %v918_v3, 0.0 }
 0x146   :  { %v1275_v9 = vmax.f32 %v929_v5, 0.0 }
 0x147   :  { %v1273_v11 = vmax.f32 %v921_v7, 0.0 }
 0x148   :  { %v1375_v12 = vpack.c.bf16 %v1275_v9, %v1274_v8 }
 0x149   :  { %v1374_v13 = vpack.c.bf16 %v1273_v11, %v1272_v10  ;;  %v2973_v14 = vpop.f32.mrb[56].mxu0 }
 0x14a   :  { %v942_v15 = vadd.f32 %v2973_v14, %v3547_v61  ;;  %v933_v16 = vpop.f32.mrb[57].mxu0 }
 0x14b   :  { %v934_v17 = vadd.f32 %v3547_v61, %v933_v16  ;;  %v2974_v18 = vpop.f32.mrb[58].mxu0  ;;  %3103 = vmatprep.mubr.msk.bf16.mxu1 %vm1451_vm2, %v1374_v13 }
 0x14c   :  { %v945_v19 = vadd.f32 %v2974_v18, %v3547_v61  ;;  %v936_v20 = vpop.f32.mrb[59].mxu0  ;;  %3104 = vmatmul.mubr.msk.bf16.gmra.mrb[52].mxu1 %vm1451_vm2, %v1375_v12  ;;  %v1278_v22 = vmax.f32 %v942_v15, 0.0 }
 0x14d   :  { %v937_v21 = vadd.f32 %v3547_v61, %v936_v20  ;;  %v1276_v24 = vmax.f32 %v934_v17, 0.0 }
 0x14e   :  { %v1279_v23 = vmax.f32 %v945_v19, 0.0 }
 0x14f   :  { %v1277_v25 = vmax.f32 %v937_v21, 0.0 }
 0x150   :  { %v1377_v26 = vpack.c.bf16 %v1279_v23, %v1278_v22 }
 0x151   :  { %v1376_v27 = vpack.c.bf16 %v1277_v25, %v1276_v24  ;;  %v2977_v28 = vpop.f32.mrb[60].mxu0 }
 0x152   :  { %v958_v29 = vadd.f32 %v2977_v28, %v3547_v61  ;;  %v949_v30 = vpop.f32.mrb[61].mxu0 }
 0x153   :  { %v950_v31 = vadd.f32 %v3547_v61, %v949_v30  ;;  %v2978_v32 = vpop.f32.mrb[62].mxu0  ;;  %3107 = vmatprep.mubr.msk.bf16.mxu1 %vm1451_vm2, %v1376_v27 }
 0x154   :  { %v961_v33 = vadd.f32 %v2978_v32, %v3547_v61  ;;  %v952_v34 = vpop.f32.mrb[63].mxu0  ;;  %3108 = vmatmul.mubr.msk.bf16.gmra.mrb[56].mxu1 %vm1451_vm2, %v1377_v26  ;;  %v1282_v36 = vmax.f32 %v958_v29, 0.0 }
 0x155   :  { %v953_v35 = vadd.f32 %v3547_v61, %v952_v34  ;;  %v1280_v38 = vmax.f32 %v950_v31, 0.0 }
 0x156   :  { %v1283_v37 = vmax.f32 %v961_v33, 0.0 }
 0x157   :  { %v1281_v39 = vmax.f32 %v953_v35, 0.0 }
 0x158   :  { %v1379_v40 = vpack.c.bf16 %v1283_v37, %v1282_v36 }
 0x159   :  { %v1378_v41 = vpack.c.bf16 %v1281_v39, %v1280_v38  ;;  %v2981_v42 = vpop.f32.mrb[64].mxu0 }
 0x15a   :  { %v974_v43 = vadd.f32 %v2981_v42, %v3547_v61  ;;  %v965_v44 = vpop.f32.mrb[65].mxu0 }
 0x15b   :  { %v966_v45 = vadd.f32 %v3547_v61, %v965_v44  ;;  %v2982_v46 = vpop.f32.mrb[66].mxu0  ;;  %3111 = vmatprep.mubr.msk.bf16.mxu1 %vm1451_vm2, %v1378_v41 }
 0x15c   :  { %v977_v47 = vadd.f32 %v2982_v46, %v3547_v61  ;;  %v968_v48 = vpop.f32.mrb[67].mxu0  ;;  %3112 = vmatmul.mubr.msk.bf16.gmra.mrb[60].mxu1 %vm1451_vm2, %v1379_v40  ;;  %v1286_v50 = vmax.f32 %v974_v43, 0.0 }
 0x15d   :  { %v969_v49 = vadd.f32 %v3547_v61, %v968_v48  ;;  %v1284_v52 = vmax.f32 %v966_v45, 0.0 }
 0x15e   :  { %v1287_v51 = vmax.f32 %v977_v47, 0.0 }
 0x15f   :  { %v1285_v53 = vmax.f32 %v969_v49, 0.0 }
 0x160   :  { %v1381_v54 = vpack.c.bf16 %v1287_v51, %v1286_v50 }
 0x161   :  { %v1380_v55 = vpack.c.bf16 %v1285_v53, %v1284_v52  ;;  %v2985_v56 = vpop.f32.mrb[68].mxu0 }
 0x162   :  { %v990_v57 = vadd.f32 %v2985_v56, %v3547_v61  ;;  %v981_v58 = vpop.f32.mrb[69].mxu0 }
 0x163   :  { %v982_v59 = vadd.f32 %v3547_v61, %v981_v58  ;;  %v2986_v60 = vpop.f32.mrb[70].mxu0  ;;  %3115 = vmatprep.mubr.msk.bf16.mxu1 %vm1451_vm2, %v1380_v55 }
 0x164   :  { %v993_v62 = vadd.f32 %v2986_v60, %v3547_v61  ;;  %v984_v63 = vpop.f32.mrb[71].mxu0  ;;  %3116 = vmatmul.mubr.msk.bf16.gmra.mrb[64].mxu1 %vm1451_vm2, %v1381_v54  ;;  %v1290_v1 = vmax.f32 %v990_v57, 0.0 }
 0x165   :  { %v985_v0 = vadd.f32 %v3547_v61, %v984_v63  ;;  %v1288_v3 = vmax.f32 %v982_v59, 0.0 }
 0x166   :  { %v1291_v2 = vmax.f32 %v993_v62, 0.0 }
 0x167   :  { %v1289_v4 = vmax.f32 %v985_v0, 0.0 }
 0x168   :  { %v1383_v5 = vpack.c.bf16 %v1291_v2, %v1290_v1 }
 0x169   :  { %v1382_v6 = vpack.c.bf16 %v1289_v4, %v1288_v3  ;;  %v2989_v7 = vpop.f32.mrb[72].mxu0 }
 0x16a   :  { %v1006_v8 = vadd.f32 %v2989_v7, %v3547_v61  ;;  %v997_v9 = vpop.f32.mrb[73].mxu0 }
 0x16b   :  { %v998_v10 = vadd.f32 %v3547_v61, %v997_v9  ;;  %v2990_v11 = vpop.f32.mrb[74].mxu0  ;;  %3119 = vmatprep.mubr.msk.bf16.mxu1 %vm1451_vm2, %v1382_v6 }
 0x16c   :  { %v1009_v12 = vadd.f32 %v2990_v11, %v3547_v61  ;;  %v1000_v13 = vpop.f32.mrb[75].mxu0  ;;  %3120 = vmatmul.mubr.msk.bf16.gmra.mrb[68].mxu1 %vm1451_vm2, %v1383_v5  ;;  %v1294_v15 = vmax.f32 %v1006_v8, 0.0 }
 0x16d   :  { %v1001_v14 = vadd.f32 %v3547_v61, %v1000_v13  ;;  %v1292_v17 = vmax.f32 %v998_v10, 0.0 }
 0x16e   :  { %v1295_v16 = vmax.f32 %v1009_v12, 0.0 }
 0x16f   :  { %v1293_v18 = vmax.f32 %v1001_v14, 0.0 }
 0x170   :  { %v1385_v19 = vpack.c.bf16 %v1295_v16, %v1294_v15 }
 0x171   :  { %v1384_v20 = vpack.c.bf16 %v1293_v18, %v1292_v17  ;;  %v2993_v21 = vpop.f32.mrb[76].mxu0 }
 0x172   :  { %v1022_v22 = vadd.f32 %v2993_v21, %v3547_v61  ;;  %v1013_v23 = vpop.f32.mrb[77].mxu0 }
 0x173   :  { %v1014_v24 = vadd.f32 %v3547_v61, %v1013_v23  ;;  %v2994_v25 = vpop.f32.mrb[78].mxu0  ;;  %3123 = vmatprep.mubr.msk.bf16.mxu1 %vm1451_vm2, %v1384_v20 }
 0x174   :  { %v1025_v26 = vadd.f32 %v2994_v25, %v3547_v61  ;;  %v1016_v27 = vpop.f32.mrb[79].mxu0  ;;  %3124 = vmatmul.mubr.msk.bf16.gmra.mrb[72].mxu1 %vm1451_vm2, %v1385_v19  ;;  %v1298_v29 = vmax.f32 %v1022_v22, 0.0 }
 0x175   :  { %v1017_v28 = vadd.f32 %v3547_v61, %v1016_v27  ;;  %v1296_v31 = vmax.f32 %v1014_v24, 0.0 }
 0x176   :  { %v1299_v30 = vmax.f32 %v1025_v26, 0.0 }
 0x177   :  { %v1297_v32 = vmax.f32 %v1017_v28, 0.0 }
 0x178   :  { %v1387_v33 = vpack.c.bf16 %v1299_v30, %v1298_v29 }
 0x179   :  { %v1386_v34 = vpack.c.bf16 %v1297_v32, %v1296_v31  ;;  %v2997_v35 = vpop.f32.mrb[80].mxu0 }
 0x17a   :  { %v1038_v36 = vadd.f32 %v2997_v35, %v3547_v61  ;;  %v1029_v37 = vpop.f32.mrb[81].mxu0 }
 0x17b   :  { %v1030_v38 = vadd.f32 %v3547_v61, %v1029_v37  ;;  %v2998_v39 = vpop.f32.mrb[82].mxu0  ;;  %3127 = vmatprep.mubr.msk.bf16.mxu1 %vm1451_vm2, %v1386_v34 }
 0x17c   :  { %v1041_v40 = vadd.f32 %v2998_v39, %v3547_v61  ;;  %v1032_v41 = vpop.f32.mrb[83].mxu0  ;;  %3128 = vmatmul.mubr.msk.bf16.gmra.mrb[76].mxu1 %vm1451_vm2, %v1387_v33  ;;  %v1302_v43 = vmax.f32 %v1038_v36, 0.0 }
 0x17d   :  { %v1033_v42 = vadd.f32 %v3547_v61, %v1032_v41  ;;  %v1300_v45 = vmax.f32 %v1030_v38, 0.0 }
 0x17e   :  { %v1303_v44 = vmax.f32 %v1041_v40, 0.0 }
 0x17f   :  { %v1301_v46 = vmax.f32 %v1033_v42, 0.0 }
 0x180   :  { %v1389_v47 = vpack.c.bf16 %v1303_v44, %v1302_v43 }
 0x181   :  { %v1388_v48 = vpack.c.bf16 %v1301_v46, %v1300_v45  ;;  %v3001_v49 = vpop.f32.mrb[84].mxu0 }
 0x182   :  { %v1054_v50 = vadd.f32 %v3001_v49, %v3547_v61  ;;  %v1045_v51 = vpop.f32.mrb[85].mxu0 }
 0x183   :  { %v1046_v52 = vadd.f32 %v3547_v61, %v1045_v51  ;;  %v3002_v53 = vpop.f32.mrb[86].mxu0  ;;  %3131 = vmatprep.mubr.msk.bf16.mxu1 %vm1451_vm2, %v1388_v48 }
 0x184   :  { %v1057_v54 = vadd.f32 %v3002_v53, %v3547_v61  ;;  %v1048_v55 = vpop.f32.mrb[87].mxu0  ;;  %3132 = vmatmul.mubr.msk.bf16.gmra.mrb[80].mxu1 %vm1451_vm2, %v1389_v47  ;;  %v1306_v57 = vmax.f32 %v1054_v50, 0.0 }
 0x185   :  { %v1049_v56 = vadd.f32 %v3547_v61, %v1048_v55  ;;  %v1304_v59 = vmax.f32 %v1046_v52, 0.0 }
 0x186   :  { %v1307_v58 = vmax.f32 %v1057_v54, 0.0 }
 0x187   :  { %v1305_v60 = vmax.f32 %v1049_v56, 0.0 }
 0x188   :  { %v1391_v62 = vpack.c.bf16 %v1307_v58, %v1306_v57 }
 0x189   :  { %v1390_v63 = vpack.c.bf16 %v1305_v60, %v1304_v59  ;;  %v3005_v0 = vpop.f32.mrb[88].mxu0 }
 0x18a   :  { %v1070_v1 = vadd.f32 %v3005_v0, %v3547_v61  ;;  %v1061_v2 = vpop.f32.mrb[89].mxu0 }
 0x18b   :  { %v1062_v3 = vadd.f32 %v3547_v61, %v1061_v2  ;;  %v3006_v4 = vpop.f32.mrb[90].mxu0  ;;  %3135 = vmatprep.mubr.msk.bf16.mxu1 %vm1451_vm2, %v1390_v63 }
 0x18c   :  { %v1073_v5 = vadd.f32 %v3006_v4, %v3547_v61  ;;  %v1064_v6 = vpop.f32.mrb[91].mxu0  ;;  %3136 = vmatmul.mubr.msk.bf16.gmra.mrb[84].mxu1 %vm1451_vm2, %v1391_v62  ;;  %v1310_v8 = vmax.f32 %v1070_v1, 0.0 }
 0x18d   :  { %v1065_v7 = vadd.f32 %v3547_v61, %v1064_v6  ;;  %v1308_v10 = vmax.f32 %v1062_v3, 0.0 }
 0x18e   :  { %v1311_v9 = vmax.f32 %v1073_v5, 0.0 }
 0x18f   :  { %v1309_v11 = vmax.f32 %v1065_v7, 0.0 }
 0x190   :  { %v1393_v12 = vpack.c.bf16 %v1311_v9, %v1310_v8 }
 0x191   :  { %v1392_v13 = vpack.c.bf16 %v1309_v11, %v1308_v10  ;;  %v3009_v14 = vpop.f32.mrb[92].mxu0 }
 0x192   :  { %v1086_v15 = vadd.f32 %v3009_v14, %v3547_v61  ;;  %v1077_v16 = vpop.f32.mrb[93].mxu0 }
 0x193   :  { %v1078_v17 = vadd.f32 %v3547_v61, %v1077_v16  ;;  %v3010_v18 = vpop.f32.mrb[94].mxu0  ;;  %3139 = vmatprep.mubr.msk.bf16.mxu1 %vm1451_vm2, %v1392_v13 }
 0x194   :  { %v1089_v19 = vadd.f32 %v3010_v18, %v3547_v61  ;;  %v1080_v20 = vpop.f32.mrb[95].mxu0  ;;  %3140 = vmatmul.mubr.msk.bf16.gmra.mrb[88].mxu1 %vm1451_vm2, %v1393_v12  ;;  %v1314_v22 = vmax.f32 %v1086_v15, 0.0 }
 0x195   :  { %v1081_v21 = vadd.f32 %v3547_v61, %v1080_v20  ;;  %v1312_v24 = vmax.f32 %v1078_v17, 0.0  ;;  %v3755_v17 = vld [vmem:[%s3951_s4] ss:$0 sm:$0xff] }
 0x196   :  { %v1315_v23 = vmax.f32 %v1089_v19, 0.0 }
 0x197   :  { %v1313_v25 = vmax.f32 %v1081_v21, 0.0 }
 0x198   :  { %v1395_v26 = vpack.c.bf16 %v1315_v23, %v1314_v22 }
 0x199   :  { %v1394_v27 = vpack.c.bf16 %v1313_v25, %v1312_v24  ;;  %v3013_v28 = vpop.f32.mrb[96].mxu0 }
 0x19a   :  { %v1102_v29 = vadd.f32 %v3013_v28, %v3547_v61  ;;  %v1093_v30 = vpop.f32.mrb[97].mxu0 }
 0x19b   :  { %v1094_v31 = vadd.f32 %v3547_v61, %v1093_v30  ;;  %v3014_v32 = vpop.f32.mrb[98].mxu0  ;;  %3143 = vmatprep.mubr.msk.bf16.mxu1 %vm1451_vm2, %v1394_v27 }
 0x19c   :  { %v1105_v33 = vadd.f32 %v3014_v32, %v3547_v61  ;;  %v1096_v34 = vpop.f32.mrb[99].mxu0  ;;  %3144 = vmatmul.mubr.msk.bf16.gmra.mrb[92].mxu1 %vm1451_vm2, %v1395_v26  ;;  %v1318_v36 = vmax.f32 %v1102_v29, 0.0 }
 0x19d   :  { %v1097_v35 = vadd.f32 %v3547_v61, %v1096_v34  ;;  %v1316_v38 = vmax.f32 %v1094_v31, 0.0 }
 0x19e   :  { %v1319_v37 = vmax.f32 %v1105_v33, 0.0 }
 0x19f   :  { %v1317_v39 = vmax.f32 %v1097_v35, 0.0 }
 0x1a0   :  { %v1397_v40 = vpack.c.bf16 %v1319_v37, %v1318_v36 }
 0x1a1   :  { %v1396_v41 = vpack.c.bf16 %v1317_v39, %v1316_v38  ;;  %v3017_v42 = vpop.f32.mrb[100].mxu0 }
 0x1a2   :  { %v1118_v43 = vadd.f32 %v3017_v42, %v3547_v61  ;;  %v1109_v44 = vpop.f32.mrb[101].mxu0 }
 0x1a3   :  { %v1110_v45 = vadd.f32 %v3547_v61, %v1109_v44  ;;  %v3018_v46 = vpop.f32.mrb[102].mxu0  ;;  %3147 = vmatprep.mubr.msk.bf16.mxu1 %vm1451_vm2, %v1396_v41 }
 0x1a4   :  { %v1121_v47 = vadd.f32 %v3018_v46, %v3547_v61  ;;  %v1112_v48 = vpop.f32.mrb[103].mxu0  ;;  %3148 = vmatmul.mubr.msk.bf16.gmra.mrb[96].mxu1 %vm1451_vm2, %v1397_v40  ;;  %v1322_v50 = vmax.f32 %v1118_v43, 0.0 }
 0x1a5   :  { %v1113_v49 = vadd.f32 %v3547_v61, %v1112_v48  ;;  %v1320_v52 = vmax.f32 %v1110_v45, 0.0 }
 0x1a6   :  { %v1323_v51 = vmax.f32 %v1121_v47, 0.0 }
 0x1a7   :  { %v1321_v53 = vmax.f32 %v1113_v49, 0.0 }
 0x1a8   :  { %v1399_v54 = vpack.c.bf16 %v1323_v51, %v1322_v50 }
 0x1a9   :  { %v1398_v55 = vpack.c.bf16 %v1321_v53, %v1320_v52  ;;  %v3021_v56 = vpop.f32.mrb[104].mxu0 }
 0x1aa   :  { %v1134_v57 = vadd.f32 %v3021_v56, %v3547_v61  ;;  %v1125_v58 = vpop.f32.mrb[105].mxu0 }
 0x1ab   :  { %v1126_v59 = vadd.f32 %v3547_v61, %v1125_v58  ;;  %v3022_v60 = vpop.f32.mrb[106].mxu0  ;;  %3151 = vmatprep.mubr.msk.bf16.mxu1 %vm1451_vm2, %v1398_v55 }
 0x1ac   :  { %v1137_v62 = vadd.f32 %v3022_v60, %v3547_v61  ;;  %v1128_v63 = vpop.f32.mrb[107].mxu0  ;;  %3152 = vmatmul.mubr.msk.bf16.gmra.mrb[100].mxu1 %vm1451_vm2, %v1399_v54  ;;  %v1326_v1 = vmax.f32 %v1134_v57, 0.0 }
 0x1ad   :  { %v1129_v0 = vadd.f32 %v3547_v61, %v1128_v63  ;;  %v1324_v3 = vmax.f32 %v1126_v59, 0.0 }
 0x1ae   :  { %v1327_v2 = vmax.f32 %v1137_v62, 0.0 }
 0x1af   :  { %v1325_v4 = vmax.f32 %v1129_v0, 0.0 }
 0x1b0   :  { %v1401_v5 = vpack.c.bf16 %v1327_v2, %v1326_v1  ;;  %v3776_v1 = vld [vmem:[%s3949_s2] ss:$0 sm:$0xff] }
 0x1b1   :  { %v1400_v6 = vpack.c.bf16 %v1325_v4, %v1324_v3  ;;  %v3025_v7 = vpop.f32.mrb[108].mxu0 }
 0x1b2   :  { %v1150_v8 = vadd.f32 %v3025_v7, %v3547_v61  ;;  %v1141_v9 = vpop.f32.mrb[109].mxu0 }
 0x1b3   :  { %v1142_v10 = vadd.f32 %v3547_v61, %v1141_v9  ;;  %v3026_v11 = vpop.f32.mrb[110].mxu0  ;;  %3155 = vmatprep.mubr.msk.bf16.mxu1 %vm1451_vm2, %v1400_v6 }
 0x1b4   :  { %v1153_v12 = vadd.f32 %v3026_v11, %v3547_v61  ;;  %v1144_v13 = vpop.f32.mrb[111].mxu0  ;;  %3156 = vmatmul.mubr.msk.bf16.gmra.mrb[104].mxu1 %vm1451_vm2, %v1401_v5  ;;  %v1330_v15 = vmax.f32 %v1150_v8, 0.0 }
 0x1b5   :  { %v1145_v14 = vadd.f32 %v3547_v61, %v1144_v13  ;;  %v1328_v18 = vmax.f32 %v1142_v10, 0.0 }
 0x1b6   :  { %v1331_v16 = vmax.f32 %v1153_v12, 0.0 }
 0x1b7   :  { %v1329_v19 = vmax.f32 %v1145_v14, 0.0  ;;  %v3053_v20 = vpop.f32.mrb[0].mxu1 }
 0x1b8   :  { %v1403_v21 = vpack.c.bf16 %v1331_v16, %v1330_v15  ;;  %v1678_v22 = vpop.f32.mrb[1].mxu1  ;;  %v1687_v30 = vadd.f32 %v3053_v20, %v3755_v17 }
 0x1b9   :  { %v1402_v23 = vpack.c.bf16 %v1329_v19, %v1328_v18  ;;  %v1679_v24 = vadd.f32 %v3755_v17, %v1678_v22  ;;  %v3029_v25 = vpop.f32.mrb[112].mxu0  ;;  %v3054_v26 = vpop.f32.mrb[2].mxu1 }
 0x1ba   :  { %v1166_v27 = vadd.f32 %v3029_v25, %v3547_v61  ;;  %v1157_v28 = vpop.f32.mrb[113].mxu0  ;;  %v1681_v29 = vpop.f32.mrb[3].mxu1  ;;  %v1690_v37 = vadd.f32 %v3054_v26, %v3755_v17  ;;  %v2191_v42 = vmax.f32 %v1687_v30, 0.0 }
 0x1bb   :  { %v1158_v31 = vadd.f32 %v3547_v61, %v1157_v28  ;;  %v1682_v32 = vadd.f32 %v3755_v17, %v1681_v29  ;;  %v3030_v33 = vpop.f32.mrb[114].mxu0  ;;  %3159 = vmatprep.mubr.msk.bf16.mxu1 %vm1451_vm2, %v1402_v23  ;;  %v2189_v36 = vmax.f32 %v1679_v24, 0.0 }
 0x1bc   :  { %v1169_v34 = vadd.f32 %v3030_v33, %v3547_v61  ;;  %v1160_v35 = vpop.f32.mrb[115].mxu0  ;;  %3160 = vmatmul.mubr.msk.bf16.gmra.mrb[108].mxu1 %vm1451_vm2, %v1403_v21  ;;  %v1334_v40 = vmax.f32 %v1166_v27, 0.0  ;;  %v2192_v49 = vmax.f32 %v1690_v37, 0.0 }
 0x1bd   :  { %v2190_v38 = vmax.f32 %v1682_v32, 0.0  ;;  %v1161_v39 = vadd.f32 %v3547_v61, %v1160_v35  ;;  %v1332_v43 = vmax.f32 %v1158_v31, 0.0 }
 0x1be   :  { %v1335_v41 = vmax.f32 %v1169_v34, 0.0 }
 0x1bf   :  { %v2317_v44 = vmax.f32 %v2189_v36, %v2190_v38  ;;  %v1333_v45 = vmax.f32 %v1161_v39, 0.0  ;;  %v3057_v46 = vpop.f32.mrb[4].mxu1 }
 0x1c0   :  { %v1405_v47 = vpack.c.bf16 %v1335_v41, %v1334_v40  ;;  %v1694_v48 = vpop.f32.mrb[5].mxu1  ;;  %v1703_v55 = vadd.f32 %v3057_v46, %v3755_v17 }
 0x1c1   :  { %v2318_v50 = vmax.f32 %v2317_v44, %v2191_v42  ;;  %v1404_v51 = vpack.c.bf16 %v1333_v45, %v1332_v43  ;;  %v1695_v52 = vadd.f32 %v3755_v17, %v1694_v48  ;;  %v3033_v53 = vpop.f32.mrb[116].mxu0  ;;  %v3058_v54 = vpop.f32.mrb[6].mxu1 }
 0x1c2   :  { %v1182_v56 = vadd.f32 %v3033_v53, %v3547_v61  ;;  %v1173_v57 = vpop.f32.mrb[117].mxu0  ;;  %v1697_v58 = vpop.f32.mrb[7].mxu1  ;;  %v1706_v5 = vadd.f32 %v3058_v54, %v3755_v17  ;;  %v2195_v9 = vmax.f32 %v1703_v55, 0.0 }
 0x1c3   :  { %v2193_v59 = vmax.f32 %v1695_v52, 0.0  ;;  %v2319_v60 = vmax.f32 %v2318_v50, %v2192_v49  ;;  %v1174_v62 = vadd.f32 %v3547_v61, %v1173_v57  ;;  %v1698_v63 = vadd.f32 %v3755_v17, %v1697_v58  ;;  %v3034_v0 = vpop.f32.mrb[118].mxu0  ;;  %3163 = vmatprep.mubr.msk.bf16.mxu1 %vm1451_vm2, %v1404_v51 }
 0x1c4   :  { %v1185_v2 = vadd.f32 %v3776_v1, %v3034_v0  ;;  %v1176_v3 = vpop.f32.mrb[119].mxu0  ;;  %3164 = vmatmul.mubr.msk.bf16.gmra.mrb[112].mxu1 %vm1451_vm2, %v1405_v47  ;;  %v1338_v7 = vmax.f32 %v1182_v56, 0.0  ;;  %v2196_v16 = vmax.f32 %v1706_v5, 0.0 }
 0x1c5   :  { %v2320_v4 = vmax.f32 %v2319_v60, %v2193_v59  ;;  %v2194_v6 = vmax.f32 %v1698_v63, 0.0  ;;  %v1177_v61 = vadd.f32 %v3776_v1, %v1176_v3  ;;  %v1336_v10 = vmax.f32 %v1174_v62, 0.0 }
 0x1c6   :  { %v1339_v8 = vmax.f32 %v1185_v2, 0.0 }
 0x1c7   :  { %v2321_v11 = vmax.f32 %v2320_v4, %v2194_v6  ;;  %v1337_v12 = vmax.f32 %v1177_v61, 0.0  ;;  %v3061_v13 = vpop.f32.mrb[8].mxu1 }
 0x1c8   :  { %v1407_v14 = vpack.c.bf16 %v1339_v8, %v1338_v7  ;;  %v1710_v15 = vpop.f32.mrb[9].mxu1  ;;  %v1719_v27 = vadd.f32 %v3061_v13, %v3755_v17 }
 0x1c9   :  { %v2322_v18 = vmax.f32 %v2321_v11, %v2195_v9  ;;  %v1406_v19 = vpack.c.bf16 %v1337_v12, %v1336_v10  ;;  %v1711_v20 = vadd.f32 %v3755_v17, %v1710_v15  ;;  %v3037_v21 = vpop.f32.mrb[120].mxu0  ;;  %v3062_v22 = vpop.f32.mrb[10].mxu1 }
 0x1ca   :  { %v1198_v23 = vadd.f32 %v3776_v1, %v3037_v21  ;;  %v1189_v24 = vpop.f32.mrb[121].mxu0  ;;  %v1713_v25 = vpop.f32.mrb[11].mxu1  ;;  %v1722_v34 = vadd.f32 %v3062_v22, %v3755_v17  ;;  %v2199_v39 = vmax.f32 %v1719_v27, 0.0 }
 0x1cb   :  { %v2323_v26 = vmax.f32 %v2322_v18, %v2196_v16  ;;  %v1190_v28 = vadd.f32 %v3776_v1, %v1189_v24  ;;  %v1714_v29 = vadd.f32 %v3755_v17, %v1713_v25  ;;  %v3038_v30 = vpop.f32.mrb[122].mxu0  ;;  %3167 = vmatprep.mubr.msk.bf16.mxu1 %vm1451_vm2, %v1406_v19  ;;  %v2197_v33 = vmax.f32 %v1711_v20, 0.0 }
 0x1cc   :  { %v1201_v31 = vadd.f32 %v3776_v1, %v3038_v30  ;;  %v1192_v32 = vpop.f32.mrb[123].mxu0  ;;  %3168 = vmatmul.mubr.msk.bf16.gmra.mrb[116].mxu1 %vm1451_vm2, %v1407_v14  ;;  %v1342_v37 = vmax.f32 %v1198_v23, 0.0  ;;  %v2200_v46 = vmax.f32 %v1722_v34, 0.0 }
 0x1cd   :  { %v2198_v35 = vmax.f32 %v1714_v29, 0.0  ;;  %v1193_v36 = vadd.f32 %v3776_v1, %v1192_v32  ;;  %v1340_v40 = vmax.f32 %v1190_v28, 0.0  ;;  %v2324_v59 = vrot.slane %v2323_v26, 4 }
 0x1ce   :  { %v1343_v38 = vmax.f32 %v1201_v31, 0.0 }
 0x1cf   :  { %v2330_v41 = vmax.f32 %v2197_v33, %v2198_v35  ;;  %v1341_v42 = vmax.f32 %v1193_v36, 0.0  ;;  %v3065_v43 = vpop.f32.mrb[12].mxu1  ;;  %v2325_v10 = vmax.f32 %v2323_v26, %v2324_v59 }
 0x1d0   :  { %v1409_v44 = vpack.c.bf16 %v1343_v38, %v1342_v37  ;;  %v1726_v45 = vpop.f32.mrb[13].mxu1  ;;  %v1735_v60 = vadd.f32 %v3065_v43, %v3755_v17 }
 0x1d1   :  { %v2331_v47 = vmax.f32 %v2330_v41, %v2199_v39  ;;  %v1408_v48 = vpack.c.bf16 %v1341_v42, %v1340_v40  ;;  %v1727_v49 = vadd.f32 %v3755_v17, %v1726_v45  ;;  %v3041_v50 = vpop.f32.mrb[124].mxu0  ;;  %v3066_v51 = vpop.f32.mrb[14].mxu1  ;;  %v2326_v23 = vrot.slane %v2325_v10, 2 }
 0x1d2   :  { %v1214_v52 = vadd.f32 %v3776_v1, %v3041_v50  ;;  %v1205_v53 = vpop.f32.mrb[125].mxu0  ;;  %v1729_v54 = vpop.f32.mrb[15].mxu1  ;;  %v1738_v5 = vadd.f32 %v3066_v51, %v3755_v17  ;;  %v2203_v11 = vmax.f32 %v1735_v60, 0.0 }
 0x1d3   :  { %v2201_v55 = vmax.f32 %v1727_v49, 0.0  ;;  %v2332_v56 = vmax.f32 %v2331_v47, %v2200_v46  ;;  %v1206_v57 = vadd.f32 %v3776_v1, %v1205_v53  ;;  %v3042_v58 = vpop.f32.mrb[126].mxu0  ;;  %3171 = vmatprep.mubr.msk.bf16.mxu1 %vm1451_vm2, %v1408_v48  ;;  %v1730_v62 = vadd.f32 %v3755_v17, %v1729_v54 }
 0x1d4   :  { %v1217_v63 = vadd.f32 %v3776_v1, %v3042_v58  ;;  %v1208_v0 = vpop.f32.mrb[127].mxu0  ;;  %3172 = vmatmul.mubr.msk.bf16.gmra.mrb[120].mxu1 %vm1451_vm2, %v1409_v44  ;;  %v1346_v4 = vmax.f32 %v1214_v52, 0.0  ;;  %v2204_v19 = vmax.f32 %v1738_v5, 0.0  ;;  %v2327_v32 = vmax.f32 %v2325_v10, %v2326_v23 }
 0x1d5   :  { %v2333_v2 = vmax.f32 %v2332_v56, %v2201_v55  ;;  %v1209_v3 = vadd.f32 %v3776_v1, %v1208_v0  ;;  %v2202_v6 = vmax.f32 %v1730_v62, 0.0  ;;  %v1344_v7 = vmax.f32 %v1206_v57, 0.0 }
 0x1d6   :  { %v1347_v61 = vmax.f32 %v1217_v63, 0.0  ;;  %v2328_v45 = vrot.slane %v2327_v32, 1 }
 0x1d7   :  { %v1345_v8 = vmax.f32 %v1209_v3, 0.0  ;;  %v3069_v9 = vpop.f32.mrb[16].mxu1  ;;  %v2334_v12 = vmax.f32 %v2333_v2, %v2202_v6 }
 0x1d8   :  { %v1411_v13 = vpack.c.bf16 %v1347_v61, %v1346_v4  ;;  %v1742_v14 = vpop.f32.mrb[17].mxu1  ;;  %v1751_v21 = vadd.f32 %v3069_v9, %v3755_v17  ;;  %v2329_v54 = vmax.f32 %v2327_v32, %v2328_v45 }
 0x1d9   :  { %v1410_v15 = vpack.c.bf16 %v1345_v8, %v1344_v7  ;;  %v1743_v16 = vadd.f32 %v3755_v17, %v1742_v14  ;;  %v3070_v18 = vpop.f32.mrb[18].mxu1  ;;  %v2335_v20 = vmax.f32 %v2334_v12, %v2203_v11 }
 0x1da   :  { %v1745_v1 = vpop.f32.mrb[19].mxu1  ;;  %v1754_v26 = vadd.f32 %v3070_v18, %v3755_v17  ;;  %v2207_v29 = vmax.f32 %v1751_v21, 0.0 }
 0x1db   :  { %v1746_v22 = vadd.f32 %v3755_v17, %v1745_v1  ;;  %3175 = vmatprep.mubr.msk.bf16.mxu1 %vm1451_vm2, %v1410_v15  ;;  %v2336_v24 = vmax.f32 %v2335_v20, %v2204_v19  ;;  %v2205_v25 = vmax.f32 %v1743_v16, 0.0 }
 0x1dc   :  { %3176 = vmatmul.mubr.msk.bf16.gmra.mrb[124].mxu1 %vm1451_vm2, %v1411_v13  ;;  %v2208_v35 = vmax.f32 %v1754_v26, 0.0 }
 0x1dd   :  { %v2206_v27 = vmax.f32 %v1746_v22, 0.0  ;;  %v2337_v28 = vrot.slane %v2336_v24, 4 }
 0x1df   :  { %v2343_v30 = vmax.f32 %v2205_v25, %v2206_v27  ;;  %v3073_v31 = vpop.f32.mrb[20].mxu1  ;;  %v2338_v33 = vmax.f32 %v2336_v24, %v2337_v28 }
 0x1e0   :  { %v1758_v34 = vpop.f32.mrb[21].mxu1  ;;  %v1767_v41 = vadd.f32 %v3073_v31, %v3755_v17 }
 0x1e1   :  { %v2344_v36 = vmax.f32 %v2343_v30, %v2207_v29  ;;  %v1759_v37 = vadd.f32 %v3755_v17, %v1758_v34  ;;  %v3074_v38 = vpop.f32.mrb[22].mxu1  ;;  %v2339_v39 = vrot.slane %v2338_v33, 2 }
 0x1e2   :  { %v1761_v40 = vpop.f32.mrb[23].mxu1  ;;  %v1770_v48 = vadd.f32 %v3074_v38, %v3755_v17  ;;  %v2211_v51 = vmax.f32 %v1767_v41, 0.0 }
 0x1e3   :  { %v2209_v42 = vmax.f32 %v1759_v37, 0.0  ;;  %v2345_v43 = vmax.f32 %v2344_v36, %v2208_v35  ;;  %v1762_v44 = vadd.f32 %v3755_v17, %v1761_v40  ;;  %v2340_v46 = vmax.f32 %v2338_v33, %v2339_v39 }
 0x1e4   :  { %v2212_v57 = vmax.f32 %v1770_v48, 0.0 }
 0x1e5   :  { %v2346_v47 = vmax.f32 %v2345_v43, %v2209_v42  ;;  %v2210_v49 = vmax.f32 %v1762_v44, 0.0  ;;  %v2341_v50 = vrot.slane %v2340_v46, 1 }
 0x1e7   :  { %v2347_v52 = vmax.f32 %v2346_v47, %v2210_v49  ;;  %v3077_v53 = vpop.f32.mrb[24].mxu1  ;;  %v2342_v55 = vmax.f32 %v2340_v46, %v2341_v50 }
 0x1e8   :  { %v1774_v56 = vpop.f32.mrb[25].mxu1  ;;  %v1783_v2 = vadd.f32 %v3077_v53, %v3755_v17 }
 0x1e9   :  { %v2348_v58 = vmax.f32 %v2347_v52, %v2211_v51  ;;  %v1775_v59 = vadd.f32 %v3755_v17, %v1774_v56  ;;  %v3078_v60 = vpop.f32.mrb[26].mxu1  ;;  %v2542_v62 = vsel %vm2541_vm3, %v2342_v55, %v2329_v54 }
 0x1ea   :  { %v1777_v63 = vpop.f32.mrb[27].mxu1  ;;  %v1786_v6 = vadd.f32 %v3078_v60, %v3755_v17  ;;  %v2215_v8 = vmax.f32 %v1783_v2, 0.0 }
 0x1eb   :  { %v2349_v0 = vmax.f32 %v2348_v58, %v2212_v57  ;;  %v1778_v3 = vadd.f32 %v3755_v17, %v1777_v63  ;;  %v2213_v5 = vmax.f32 %v1775_v59, 0.0 }
 0x1ec   :  { %v2216_v13 = vmax.f32 %v1786_v6, 0.0 }
 0x1ed   :  { %v2350_v4 = vrot.slane %v2349_v0, 4  ;;  %v2214_v61 = vmax.f32 %v1778_v3, 0.0 }
 0x1ef   :  { %v2351_v7 = vmax.f32 %v2349_v0, %v2350_v4  ;;  %v2356_v9 = vmax.f32 %v2213_v5, %v2214_v61  ;;  %v3081_v10 = vpop.f32.mrb[28].mxu1 }
 0x1f0   :  { %v1790_v11 = vpop.f32.mrb[29].mxu1  ;;  %v1799_v18 = vadd.f32 %v3081_v10, %v3755_v17 }
 0x1f1   :  { %v2352_v12 = vrot.slane %v2351_v7, 2  ;;  %v2357_v14 = vmax.f32 %v2356_v9, %v2215_v8  ;;  %v1791_v15 = vadd.f32 %v3755_v17, %v1790_v11  ;;  %v3082_v16 = vpop.f32.mrb[30].mxu1 }
 0x1f2   :  { %v1793_v19 = vpop.f32.mrb[31].mxu1  ;;  %v1802_v25 = vadd.f32 %v3082_v16, %v3755_v17  ;;  %v2219_v28 = vmax.f32 %v1799_v18, 0.0 }
 0x1f3   :  { %v2353_v20 = vmax.f32 %v2351_v7, %v2352_v12  ;;  %v2217_v1 = vmax.f32 %v1791_v15, 0.0  ;;  %v2358_v21 = vmax.f32 %v2357_v14, %v2216_v13  ;;  %v1794_v22 = vadd.f32 %v3755_v17, %v1793_v19 }
 0x1f4   :  { %v2220_v33 = vmax.f32 %v1802_v25, 0.0 }
 0x1f5   :  { %v2354_v23 = vrot.slane %v2353_v20, 1  ;;  %v2359_v24 = vmax.f32 %v2358_v21, %v2217_v1  ;;  %v2218_v26 = vmax.f32 %v1794_v22, 0.0 }
 0x1f7   :  { %v2355_v27 = vmax.f32 %v2353_v20, %v2354_v23  ;;  %v2360_v29 = vmax.f32 %v2359_v24, %v2218_v26  ;;  %v3085_v30 = vpop.f32.mrb[32].mxu1 }
 0x1f8   :  { %v1806_v31 = vpop.f32.mrb[33].mxu1  ;;  %v1815_v39 = vadd.f32 %v3085_v30, %v3755_v17 }
 0x1f9   :  { %v2544_v32 = vsel %vm2543_vm4, %v2355_v27, %v2542_v62  ;;  %v2361_v34 = vmax.f32 %v2360_v29, %v2219_v28  ;;  %v1807_v35 = vadd.f32 %v3755_v17, %v1806_v31  ;;  %v3086_v36 = vpop.f32.mrb[34].mxu1 }
 0x1fa   :  { %v1809_v37 = vpop.f32.mrb[35].mxu1  ;;  %v1818_v43 = vadd.f32 %v3086_v36, %v3755_v17  ;;  %v2223_v46 = vmax.f32 %v1815_v39, 0.0 }
 0x1fb   :  { %v2362_v38 = vmax.f32 %v2361_v34, %v2220_v33  ;;  %v1810_v40 = vadd.f32 %v3755_v17, %v1809_v37  ;;  %v2221_v42 = vmax.f32 %v1807_v35, 0.0 }
 0x1fc   :  { %v2224_v51 = vmax.f32 %v1818_v43, 0.0 }
 0x1fd   :  { %v2363_v41 = vrot.slane %v2362_v38, 4  ;;  %v2222_v44 = vmax.f32 %v1810_v40, 0.0 }
 0x1ff   :  { %v2364_v45 = vmax.f32 %v2362_v38, %v2363_v41  ;;  %v2369_v47 = vmax.f32 %v2221_v42, %v2222_v44  ;;  %v3089_v48 = vpop.f32.mrb[36].mxu1 }
 0x200   :  { %v1822_v49 = vpop.f32.mrb[37].mxu1  ;;  %v1831_v55 = vadd.f32 %v3089_v48, %v3755_v17 }
 0x201   :  { %v2365_v50 = vrot.slane %v2364_v45, 2  ;;  %v2370_v52 = vmax.f32 %v2369_v47, %v2223_v46  ;;  %v1823_v53 = vadd.f32 %v3755_v17, %v1822_v49  ;;  %v3090_v54 = vpop.f32.mrb[38].mxu1 }
 0x202   :  { %v1825_v56 = vpop.f32.mrb[39].mxu1  ;;  %v1834_v0 = vadd.f32 %v3090_v54, %v3755_v17  ;;  %v2227_v4 = vmax.f32 %v1831_v55, 0.0 }
 0x203   :  { %v2366_v57 = vmax.f32 %v2364_v45, %v2365_v50  ;;  %v2225_v58 = vmax.f32 %v1823_v53, 0.0  ;;  %v2371_v59 = vmax.f32 %v2370_v52, %v2224_v51  ;;  %v1826_v60 = vadd.f32 %v3755_v17, %v1825_v56 }
 0x204   :  { %v2228_v8 = vmax.f32 %v1834_v0, 0.0 }
 0x205   :  { %v2367_v62 = vrot.slane %v2366_v57, 1  ;;  %v2372_v63 = vmax.f32 %v2371_v59, %v2225_v58  ;;  %v2226_v2 = vmax.f32 %v1826_v60, 0.0 }
 0x207   :  { %v2368_v3 = vmax.f32 %v2366_v57, %v2367_v62  ;;  %v2373_v5 = vmax.f32 %v2372_v63, %v2226_v2  ;;  %v3093_v6 = vpop.f32.mrb[40].mxu1 }
 0x208   :  { %v1838_v61 = vpop.f32.mrb[41].mxu1  ;;  %v1847_v14 = vadd.f32 %v3093_v6, %v3755_v17 }
 0x209   :  { %v2546_v7 = vsel %vm2545_vm5, %v2368_v3, %v2544_v32  ;;  %v2374_v9 = vmax.f32 %v2373_v5, %v2227_v4  ;;  %v1839_v10 = vadd.f32 %v3755_v17, %v1838_v61  ;;  %v3094_v11 = vpop.f32.mrb[42].mxu1 }
 0x20a   :  { %v1841_v12 = vpop.f32.mrb[43].mxu1  ;;  %v1850_v19 = vadd.f32 %v3094_v11, %v3755_v17  ;;  %v2231_v21 = vmax.f32 %v1847_v14, 0.0 }
 0x20b   :  { %v2375_v13 = vmax.f32 %v2374_v9, %v2228_v8  ;;  %v1842_v15 = vadd.f32 %v3755_v17, %v1841_v12  ;;  %v2229_v18 = vmax.f32 %v1839_v10, 0.0 }
 0x20c   :  { %v2232_v26 = vmax.f32 %v1850_v19, 0.0 }
 0x20d   :  { %v2376_v16 = vrot.slane %v2375_v13, 4  ;;  %v2230_v20 = vmax.f32 %v1842_v15, 0.0 }
 0x20f   :  { %v2377_v1 = vmax.f32 %v2375_v13, %v2376_v16  ;;  %v2382_v22 = vmax.f32 %v2229_v18, %v2230_v20  ;;  %v3097_v23 = vpop.f32.mrb[44].mxu1 }
 0x210   :  { %v1854_v24 = vpop.f32.mrb[45].mxu1  ;;  %v1863_v30 = vadd.f32 %v3097_v23, %v3755_v17 }
 0x211   :  { %v2378_v25 = vrot.slane %v2377_v1, 2  ;;  %v2383_v27 = vmax.f32 %v2382_v22, %v2231_v21  ;;  %v1855_v28 = vadd.f32 %v3755_v17, %v1854_v24  ;;  %v3098_v29 = vpop.f32.mrb[46].mxu1 }
 0x212   :  { %v1857_v31 = vpop.f32.mrb[47].mxu1  ;;  %v1866_v38 = vadd.f32 %v3098_v29, %v3755_v17  ;;  %v2235_v41 = vmax.f32 %v1863_v30, 0.0 }
 0x213   :  { %v2379_v32 = vmax.f32 %v2377_v1, %v2378_v25  ;;  %v2233_v33 = vmax.f32 %v1855_v28, 0.0  ;;  %v2384_v34 = vmax.f32 %v2383_v27, %v2232_v26  ;;  %v1858_v35 = vadd.f32 %v3755_v17, %v1857_v31 }
 0x214   :  { %v2236_v45 = vmax.f32 %v1866_v38, 0.0 }
 0x215   :  { %v2380_v36 = vrot.slane %v2379_v32, 1  ;;  %v2385_v37 = vmax.f32 %v2384_v34, %v2233_v33  ;;  %v2234_v39 = vmax.f32 %v1858_v35, 0.0 }
 0x217   :  { %v2381_v40 = vmax.f32 %v2379_v32, %v2380_v36  ;;  %v2386_v42 = vmax.f32 %v2385_v37, %v2234_v39  ;;  %v3101_v43 = vpop.f32.mrb[48].mxu1 }
 0x218   :  { %v1870_v44 = vpop.f32.mrb[49].mxu1  ;;  %v1879_v52 = vadd.f32 %v3101_v43, %v3755_v17 }
 0x219   :  { %v2387_v46 = vmax.f32 %v2386_v42, %v2235_v41  ;;  %v1871_v47 = vadd.f32 %v3755_v17, %v1870_v44  ;;  %v3102_v48 = vpop.f32.mrb[50].mxu1  ;;  %v2548_v49 = vsel %vm2547_vm6, %v2381_v40, %v2546_v7 }
 0x21a   :  { %v1873_v50 = vpop.f32.mrb[51].mxu1  ;;  %v1882_v56 = vadd.f32 %v3102_v48, %v3755_v17  ;;  %v2239_v59 = vmax.f32 %v1879_v52, 0.0 }
 0x21b   :  { %v2388_v51 = vmax.f32 %v2387_v46, %v2236_v45  ;;  %v1874_v53 = vadd.f32 %v3755_v17, %v1873_v50  ;;  %v2237_v55 = vmax.f32 %v1871_v47, 0.0 }
 0x21c   :  { %v2240_v2 = vmax.f32 %v1882_v56, 0.0 }
 0x21d   :  { %v2389_v54 = vrot.slane %v2388_v51, 4  ;;  %v2238_v57 = vmax.f32 %v1874_v53, 0.0 }
 0x21f   :  { %v2390_v58 = vmax.f32 %v2388_v51, %v2389_v54  ;;  %v2395_v60 = vmax.f32 %v2237_v55, %v2238_v57  ;;  %v3105_v62 = vpop.f32.mrb[52].mxu1 }
 0x220   :  { %v1886_v63 = vpop.f32.mrb[53].mxu1  ;;  %v1895_v6 = vadd.f32 %v3105_v62, %v3755_v17 }
 0x221   :  { %v2391_v0 = vrot.slane %v2390_v58, 2  ;;  %v2396_v3 = vmax.f32 %v2395_v60, %v2239_v59  ;;  %v1887_v4 = vadd.f32 %v3755_v17, %v1886_v63  ;;  %v3106_v5 = vpop.f32.mrb[54].mxu1 }
 0x222   :  { %v1889_v61 = vpop.f32.mrb[55].mxu1  ;;  %v1898_v13 = vadd.f32 %v3106_v5, %v3755_v17  ;;  %v2243_v16 = vmax.f32 %v1895_v6, 0.0 }
 0x223   :  { %v2392_v7 = vmax.f32 %v2390_v58, %v2391_v0  ;;  %v2241_v8 = vmax.f32 %v1887_v4, 0.0  ;;  %v2397_v9 = vmax.f32 %v2396_v3, %v2240_v2  ;;  %v1890_v10 = vadd.f32 %v3755_v17, %v1889_v61 }
 0x224   :  { %v2244_v1 = vmax.f32 %v1898_v13, 0.0 }
 0x225   :  { %v2393_v11 = vrot.slane %v2392_v7, 1  ;;  %v2398_v12 = vmax.f32 %v2397_v9, %v2241_v8  ;;  %v2242_v14 = vmax.f32 %v1890_v10, 0.0 }
 0x227   :  { %v2394_v15 = vmax.f32 %v2392_v7, %v2393_v11  ;;  %v2399_v18 = vmax.f32 %v2398_v12, %v2242_v14  ;;  %v3109_v19 = vpop.f32.mrb[56].mxu1 }
 0x228   :  { %v1902_v20 = vpop.f32.mrb[57].mxu1  ;;  %v1911_v27 = vadd.f32 %v3109_v19, %v3755_v17 }
 0x229   :  { %v2400_v21 = vmax.f32 %v2399_v18, %v2243_v16  ;;  %v1903_v22 = vadd.f32 %v3755_v17, %v1902_v20  ;;  %v3110_v23 = vpop.f32.mrb[58].mxu1  ;;  %v2550_v24 = vsel %vm2549_vm7, %v2394_v15, %v2548_v49 }
 0x22a   :  { %v1905_v25 = vpop.f32.mrb[59].mxu1  ;;  %v1914_v31 = vadd.f32 %v3110_v23, %v3755_v17  ;;  %v2247_v34 = vmax.f32 %v1911_v27, 0.0 }
 0x22b   :  { %v2401_v26 = vmax.f32 %v2400_v21, %v2244_v1  ;;  %v1906_v28 = vadd.f32 %v3755_v17, %v1905_v25  ;;  %v2245_v30 = vmax.f32 %v1903_v22, 0.0 }
 0x22c   :  { %v2248_v39 = vmax.f32 %v1914_v31, 0.0 }
 0x22d   :  { %v2402_v29 = vrot.slane %v2401_v26, 4  ;;  %v2246_v32 = vmax.f32 %v1906_v28, 0.0 }
 0x22f   :  { %v2403_v33 = vmax.f32 %v2401_v26, %v2402_v29  ;;  %v2408_v35 = vmax.f32 %v2245_v30, %v2246_v32  ;;  %v3113_v36 = vpop.f32.mrb[60].mxu1 }
 0x230   :  { %v1918_v37 = vpop.f32.mrb[61].mxu1  ;;  %v1927_v43 = vadd.f32 %v3113_v36, %v3755_v17 }
 0x231   :  { %v2404_v38 = vrot.slane %v2403_v33, 2  ;;  %v2409_v40 = vmax.f32 %v2408_v35, %v2247_v34  ;;  %v1919_v41 = vadd.f32 %v3755_v17, %v1918_v37  ;;  %v3114_v42 = vpop.f32.mrb[62].mxu1 }
 0x232   :  { %v1921_v44 = vpop.f32.mrb[63].mxu1  ;;  %v1930_v51 = vadd.f32 %v3114_v42, %v3755_v17  ;;  %v2251_v54 = vmax.f32 %v1927_v43, 0.0 }
 0x233   :  { %v2405_v45 = vmax.f32 %v2403_v33, %v2404_v38  ;;  %v2249_v46 = vmax.f32 %v1919_v41, 0.0  ;;  %v2410_v47 = vmax.f32 %v2409_v40, %v2248_v39  ;;  %v1922_v48 = vadd.f32 %v3755_v17, %v1921_v44 }
 0x234   :  { %v2252_v58 = vmax.f32 %v1930_v51, 0.0 }
 0x235   :  { %v2406_v49 = vrot.slane %v2405_v45, 1  ;;  %v2411_v50 = vmax.f32 %v2410_v47, %v2249_v46  ;;  %v2250_v52 = vmax.f32 %v1922_v48, 0.0 }
 0x237   :  { %v2407_v53 = vmax.f32 %v2405_v45, %v2406_v49  ;;  %v2412_v55 = vmax.f32 %v2411_v50, %v2250_v52  ;;  %v3117_v56 = vpop.f32.mrb[64].mxu1 }
 0x238   :  { %v1934_v57 = vpop.f32.mrb[65].mxu1  ;;  %v1943_v3 = vadd.f32 %v3117_v56, %v3755_v17 }
 0x239   :  { %v2413_v59 = vmax.f32 %v2412_v55, %v2251_v54  ;;  %v1935_v60 = vadd.f32 %v3755_v17, %v1934_v57  ;;  %v3118_v62 = vpop.f32.mrb[66].mxu1  ;;  %v2552_v63 = vsel %vm2551_vm8, %v2407_v53, %v2550_v24 }
 0x23a   :  { %v1937_v0 = vpop.f32.mrb[67].mxu1  ;;  %v1946_v61 = vadd.f32 %v3118_v62, %v3755_v17  ;;  %v2255_v9 = vmax.f32 %v1943_v3, 0.0 }
 0x23b   :  { %v2414_v2 = vmax.f32 %v2413_v59, %v2252_v58  ;;  %v1938_v4 = vadd.f32 %v3755_v17, %v1937_v0  ;;  %v2253_v6 = vmax.f32 %v1935_v60, 0.0 }
 0x23c   :  { %v2256_v14 = vmax.f32 %v1946_v61, 0.0 }
 0x23d   :  { %v2415_v5 = vrot.slane %v2414_v2, 4  ;;  %v2254_v7 = vmax.f32 %v1938_v4, 0.0 }
 0x23f   :  { %v2416_v8 = vmax.f32 %v2414_v2, %v2415_v5  ;;  %v2421_v10 = vmax.f32 %v2253_v6, %v2254_v7  ;;  %v3121_v11 = vpop.f32.mrb[68].mxu1 }
 0x240   :  { %v1950_v12 = vpop.f32.mrb[69].mxu1  ;;  %v1959_v19 = vadd.f32 %v3121_v11, %v3755_v17 }
 0x241   :  { %v2417_v13 = vrot.slane %v2416_v8, 2  ;;  %v2422_v15 = vmax.f32 %v2421_v10, %v2255_v9  ;;  %v1951_v16 = vadd.f32 %v3755_v17, %v1950_v12  ;;  %v3122_v18 = vpop.f32.mrb[70].mxu1 }
 0x242   :  { %v1953_v20 = vpop.f32.mrb[71].mxu1  ;;  %v1962_v26 = vadd.f32 %v3122_v18, %v3755_v17  ;;  %v2259_v29 = vmax.f32 %v1959_v19, 0.0 }
 0x243   :  { %v2418_v1 = vmax.f32 %v2416_v8, %v2417_v13  ;;  %v2257_v21 = vmax.f32 %v1951_v16, 0.0  ;;  %v2423_v22 = vmax.f32 %v2422_v15, %v2256_v14  ;;  %v1954_v23 = vadd.f32 %v3755_v17, %v1953_v20 }
 0x244   :  { %v2260_v33 = vmax.f32 %v1962_v26, 0.0 }
 0x245   :  { %v2419_v24 = vrot.slane %v2418_v1, 1  ;;  %v2424_v25 = vmax.f32 %v2423_v22, %v2257_v21  ;;  %v2258_v27 = vmax.f32 %v1954_v23, 0.0 }
 0x247   :  { %v2420_v28 = vmax.f32 %v2418_v1, %v2419_v24  ;;  %v2425_v30 = vmax.f32 %v2424_v25, %v2258_v27  ;;  %v3125_v31 = vpop.f32.mrb[72].mxu1 }
 0x248   :  { %v1966_v32 = vpop.f32.mrb[73].mxu1  ;;  %v1975_v40 = vadd.f32 %v3125_v31, %v3755_v17 }
 0x249   :  { %v2426_v34 = vmax.f32 %v2425_v30, %v2259_v29  ;;  %v1967_v35 = vadd.f32 %v3755_v17, %v1966_v32  ;;  %v3126_v36 = vpop.f32.mrb[74].mxu1  ;;  %v2554_v37 = vsel %vm2553_vm9, %v2420_v28, %v2552_v63 }
 0x24a   :  { %v1969_v38 = vpop.f32.mrb[75].mxu1  ;;  %2564 = vst [vmem:[#allocation2] sm:$0xff] %v2554_v37  ;;  %v1978_v43 = vadd.f32 %v3126_v36, %v3755_v17  ;;  %v2263_v45 = vmax.f32 %v1975_v40, 0.0 }
 0x24b   :  { %v2427_v39 = vmax.f32 %v2426_v34, %v2260_v33  ;;  %v1970_v41 = vadd.f32 %v3755_v17, %v1969_v38  ;;  %v2261_v42 = vmax.f32 %v1967_v35, 0.0 }
 0x24c   :  { %v2264_v49 = vmax.f32 %v1978_v43, 0.0 }
 0x24d   :  { %v2262_v44 = vmax.f32 %v1970_v41, 0.0  ;;  %v2428_v53 = vrot.slane %v2427_v39, 4 }
 0x24f   :  { %v2434_v46 = vmax.f32 %v2261_v42, %v2262_v44  ;;  %v3129_v47 = vpop.f32.mrb[76].mxu1  ;;  %v2429_v63 = vmax.f32 %v2427_v39, %v2428_v53 }
 0x250   :  { %v1982_v48 = vpop.f32.mrb[77].mxu1  ;;  %v1991_v55 = vadd.f32 %v3129_v47, %v3755_v17 }
 0x251   :  { %v2435_v50 = vmax.f32 %v2434_v46, %v2263_v45  ;;  %v1983_v51 = vadd.f32 %v3755_v17, %v1982_v48  ;;  %v3130_v52 = vpop.f32.mrb[78].mxu1  ;;  %v2430_v8 = vrot.slane %v2429_v63, 2 }
 0x252   :  { %v1985_v54 = vpop.f32.mrb[79].mxu1  ;;  %v1994_v60 = vadd.f32 %v3130_v52, %v3755_v17  ;;  %v2267_v0 = vmax.f32 %v1991_v55, 0.0 }
 0x253   :  { %v2265_v56 = vmax.f32 %v1983_v51, 0.0  ;;  %v2436_v57 = vmax.f32 %v2435_v50, %v2264_v49  ;;  %v1986_v58 = vadd.f32 %v3755_v17, %v1985_v54  ;;  %v2431_v18 = vmax.f32 %v2429_v63, %v2430_v8 }
 0x254   :  { %v2268_v5 = vmax.f32 %v1994_v60, 0.0 }
 0x255   :  { %v2437_v59 = vmax.f32 %v2436_v57, %v2265_v56  ;;  %v2266_v62 = vmax.f32 %v1986_v58, 0.0  ;;  %v2432_v28 = vrot.slane %v2431_v18, 1 }
 0x257   :  { %v2438_v2 = vmax.f32 %v2437_v59, %v2266_v62  ;;  %v3133_v3 = vpop.f32.mrb[80].mxu1  ;;  %v2433_v39 = vmax.f32 %v2431_v18, %v2432_v28 }
 0x258   :  { %v1998_v4 = vpop.f32.mrb[81].mxu1  ;;  %v2007_v11 = vadd.f32 %v3133_v3, %v3755_v17 }
 0x259   :  { %v2439_v6 = vmax.f32 %v2438_v2, %v2267_v0  ;;  %v1999_v61 = vadd.f32 %v3755_v17, %v1998_v4  ;;  %v3134_v7 = vpop.f32.mrb[82].mxu1 }
 0x25a   :  { %v2001_v9 = vpop.f32.mrb[83].mxu1  ;;  %v2010_v15 = vadd.f32 %v3134_v7, %v3755_v17  ;;  %v2271_v20 = vmax.f32 %v2007_v11, 0.0 }
 0x25b   :  { %v2440_v10 = vmax.f32 %v2439_v6, %v2268_v5  ;;  %v2002_v12 = vadd.f32 %v3755_v17, %v2001_v9  ;;  %v2269_v14 = vmax.f32 %v1999_v61, 0.0 }
 0x25c   :  { %v2272_v24 = vmax.f32 %v2010_v15, 0.0 }
 0x25d   :  { %v2441_v13 = vrot.slane %v2440_v10, 4  ;;  %v2270_v16 = vmax.f32 %v2002_v12, 0.0 }
 0x25f   :  { %v2442_v19 = vmax.f32 %v2440_v10, %v2441_v13  ;;  %v2447_v1 = vmax.f32 %v2269_v14, %v2270_v16  ;;  %v3137_v21 = vpop.f32.mrb[84].mxu1  ;;  %v3893_v10 = vld [vmem:[%s3951_s4] ss:$0 sm:$0xff]  ;;  %s3277_s4 = smov [#allocation2]  }
 0x260   :  { %v2014_v22 = vpop.f32.mrb[85].mxu1  ;;  %v2023_v29 = vadd.f32 %v3137_v21, %v3755_v17  ;;  %s2571_s28 = sshll.u32 %s3277_s4, 4  ;;  %s2572_s28 = int_to_ptr.vmem [resolvable:$true] %s2571_s28 }
 0x261   :  { %v2443_v23 = vrot.slane %v2442_v19, 2  ;;  %v2448_v25 = vmax.f32 %v2447_v1, %v2271_v20  ;;  %v2015_v26 = vadd.f32 %v3755_v17, %v2014_v22  ;;  %v3138_v27 = vpop.f32.mrb[86].mxu1  ;;  %s3253_s29 = scalar_lea.vmem %s2572_s28, 256  ;;  %p3258_p1 = scmp.lt.s32.totalorder %s2572_s28, %s2572_s28 }
 0x262   :  { %v2017_v30 = vpop.f32.mrb[87].mxu1  ;;  %v2026_v37 = vadd.f32 %v3138_v27, %v3755_v17  ;;  %v2275_v41 = vmax.f32 %v2023_v29, 0.0  ;;  %p3254_p0 = scmp.ne.s32.totalorder %s2572_s28, %s3253_s29  ;;  %p3259_p2 = scmp.lt.s32.totalorder %s3253_s29, %s3253_s29 }
 0x263   :  { %v2444_v31 = vmax.f32 %v2442_v19, %v2443_v23  ;;  %v2273_v32 = vmax.f32 %v2015_v26, 0.0  ;;  %v2449_v33 = vmax.f32 %v2448_v25, %v2272_v24  ;;  %v2018_v34 = vadd.f32 %v3755_v17, %v2017_v30 }
 0x264   :  { %v2276_v46 = vmax.f32 %v2026_v37, 0.0  ;;  %p3260_p3 = por %p3259_p2, %p3258_p1 }
 0x265   :  { %v2445_v35 = vrot.slane %v2444_v31, 1  ;;  %v2450_v36 = vmax.f32 %v2449_v33, %v2273_v32  ;;  %v2274_v38 = vmax.f32 %v2018_v34, 0.0 }
 0x266   :  { %p3261_p4 = pnand %p3260_p3, %p3254_p0 }
 0x267   :  { %v2446_v40 = vmax.f32 %v2444_v31, %v2445_v35  ;;  %v2451_v42 = vmax.f32 %v2450_v36, %v2274_v38  ;;  %v3141_v43 = vpop.f32.mrb[88].mxu1 }
 0x268   :  { %v2030_v44 = vpop.f32.mrb[89].mxu1  ;;  %v2039_v52 = vadd.f32 %v3141_v43, %v3755_v17 }
 0x269   :  { %v2555_v45 = vsel %vm2541_vm3, %v2446_v40, %v2433_v39  ;;  %v2452_v47 = vmax.f32 %v2451_v42, %v2275_v41  ;;  %v2031_v48 = vadd.f32 %v3755_v17, %v2030_v44  ;;  %v3142_v49 = vpop.f32.mrb[90].mxu1 }
 0x26a   :  { %v2033_v50 = vpop.f32.mrb[91].mxu1  ;;  %v2042_v56 = vadd.f32 %v3142_v49, %v3755_v17  ;;  %v2279_v59 = vmax.f32 %v2039_v52, 0.0 }
 0x26b   :  { %v2453_v51 = vmax.f32 %v2452_v47, %v2276_v46  ;;  %v2034_v53 = vadd.f32 %v3755_v17, %v2033_v50  ;;  %v2277_v55 = vmax.f32 %v2031_v48, 0.0 }
 0x26c   :  { %v2280_v2 = vmax.f32 %v2042_v56, 0.0 }
 0x26d   :  { %v2454_v54 = vrot.slane %v2453_v51, 4  ;;  %v2278_v57 = vmax.f32 %v2034_v53, 0.0 }
 0x26f   :  { %v2455_v58 = vmax.f32 %v2453_v51, %v2454_v54  ;;  %v2460_v60 = vmax.f32 %v2277_v55, %v2278_v57  ;;  %v3145_v62 = vpop.f32.mrb[92].mxu1 }
 0x270   :  { %v2046_v63 = vpop.f32.mrb[93].mxu1  ;;  %v2055_v6 = vadd.f32 %v3145_v62, %v3755_v17 }
 0x271   :  { %v2456_v0 = vrot.slane %v2455_v58, 2  ;;  %v2461_v3 = vmax.f32 %v2460_v60, %v2279_v59  ;;  %v2047_v4 = vadd.f32 %v3755_v17, %v2046_v63  ;;  %v3146_v5 = vpop.f32.mrb[94].mxu1 }
 0x272   :  { %v2049_v61 = vpop.f32.mrb[95].mxu1  ;;  %v2058_v14 = vadd.f32 %v3893_v10, %v3146_v5  ;;  %v2283_v18 = vmax.f32 %v2055_v6, 0.0 }
 0x273   :  { %v2457_v7 = vmax.f32 %v2455_v58, %v2456_v0  ;;  %v2281_v8 = vmax.f32 %v2047_v4, 0.0  ;;  %v2462_v9 = vmax.f32 %v2461_v3, %v2280_v2  ;;  %v2050_v11 = vadd.f32 %v3893_v10, %v2049_v61 }
 0x274   :  { %v2284_v21 = vmax.f32 %v2058_v14, 0.0 }
 0x275   :  { %v2458_v12 = vrot.slane %v2457_v7, 1  ;;  %v2463_v13 = vmax.f32 %v2462_v9, %v2281_v8  ;;  %v2282_v15 = vmax.f32 %v2050_v11, 0.0 }
 0x277   :  { %v2459_v16 = vmax.f32 %v2457_v7, %v2458_v12  ;;  %v2464_v19 = vmax.f32 %v2463_v13, %v2282_v15  ;;  %v3149_v17 = vpop.f32.mrb[96].mxu1 }
 0x278   :  { %v2062_v20 = vpop.f32.mrb[97].mxu1  ;;  %v2071_v27 = vadd.f32 %v3893_v10, %v3149_v17 }
 0x279   :  { %v2556_v1 = vsel %vm2543_vm4, %v2459_v16, %v2555_v45  ;;  %v2465_v22 = vmax.f32 %v2464_v19, %v2283_v18  ;;  %v2063_v23 = vadd.f32 %v3893_v10, %v2062_v20  ;;  %v3150_v24 = vpop.f32.mrb[98].mxu1 }
 0x27a   :  { %v2065_v25 = vpop.f32.mrb[99].mxu1  ;;  %v2074_v31 = vadd.f32 %v3893_v10, %v3150_v24  ;;  %v2287_v34 = vmax.f32 %v2071_v27, 0.0 }
 0x27b   :  { %v2466_v26 = vmax.f32 %v2465_v22, %v2284_v21  ;;  %v2066_v28 = vadd.f32 %v3893_v10, %v2065_v25  ;;  %v2285_v30 = vmax.f32 %v2063_v23, 0.0 }
 0x27c   :  { %v2288_v39 = vmax.f32 %v2074_v31, 0.0 }
 0x27d   :  { %v2467_v29 = vrot.slane %v2466_v26, 4  ;;  %v2286_v32 = vmax.f32 %v2066_v28, 0.0 }
 0x27f   :  { %v2468_v33 = vmax.f32 %v2466_v26, %v2467_v29  ;;  %v2473_v35 = vmax.f32 %v2285_v30, %v2286_v32  ;;  %v3153_v36 = vpop.f32.mrb[100].mxu1 }
 0x280   :  { %v2078_v37 = vpop.f32.mrb[101].mxu1  ;;  %v2087_v43 = vadd.f32 %v3893_v10, %v3153_v36 }
 0x281   :  { %v2469_v38 = vrot.slane %v2468_v33, 2  ;;  %v2474_v40 = vmax.f32 %v2473_v35, %v2287_v34  ;;  %v2079_v41 = vadd.f32 %v3893_v10, %v2078_v37  ;;  %v3154_v42 = vpop.f32.mrb[102].mxu1 }
 0x282   :  { %v2081_v44 = vpop.f32.mrb[103].mxu1  ;;  %v2090_v51 = vadd.f32 %v3893_v10, %v3154_v42  ;;  %v2291_v54 = vmax.f32 %v2087_v43, 0.0 }
 0x283   :  { %v2470_v45 = vmax.f32 %v2468_v33, %v2469_v38  ;;  %v2289_v46 = vmax.f32 %v2079_v41, 0.0  ;;  %v2475_v47 = vmax.f32 %v2474_v40, %v2288_v39  ;;  %v2082_v48 = vadd.f32 %v3893_v10, %v2081_v44 }
 0x284   :  { %v2292_v59 = vmax.f32 %v2090_v51, 0.0 }
 0x285   :  { %v2471_v49 = vrot.slane %v2470_v45, 1  ;;  %v2476_v50 = vmax.f32 %v2475_v47, %v2289_v46  ;;  %v2290_v52 = vmax.f32 %v2082_v48, 0.0 }
 0x287   :  { %v2472_v53 = vmax.f32 %v2470_v45, %v2471_v49  ;;  %v2477_v55 = vmax.f32 %v2476_v50, %v2290_v52  ;;  %v3157_v56 = vpop.f32.mrb[104].mxu1 }
 0x288   :  { %v2094_v57 = vpop.f32.mrb[105].mxu1  ;;  %v2103_v3 = vadd.f32 %v3893_v10, %v3157_v56 }
 0x289   :  { %v2557_v58 = vsel %vm2545_vm5, %v2472_v53, %v2556_v1  ;;  %v2478_v60 = vmax.f32 %v2477_v55, %v2291_v54  ;;  %v2095_v62 = vadd.f32 %v3893_v10, %v2094_v57  ;;  %v3158_v63 = vpop.f32.mrb[106].mxu1 }
 0x28a   :  { %v2097_v0 = vpop.f32.mrb[107].mxu1  ;;  %v2106_v61 = vadd.f32 %v3893_v10, %v3158_v63  ;;  %v2295_v9 = vmax.f32 %v2103_v3, 0.0 }
 0x28b   :  { %v2479_v2 = vmax.f32 %v2478_v60, %v2292_v59  ;;  %v2098_v4 = vadd.f32 %v3893_v10, %v2097_v0  ;;  %v2293_v6 = vmax.f32 %v2095_v62, 0.0 }
 0x28c   :  { %v2296_v15 = vmax.f32 %v2106_v61, 0.0 }
 0x28d   :  { %v2480_v5 = vrot.slane %v2479_v2, 4  ;;  %v2294_v7 = vmax.f32 %v2098_v4, 0.0 }
 0x28f   :  { %v2481_v8 = vmax.f32 %v2479_v2, %v2480_v5  ;;  %v2486_v11 = vmax.f32 %v2293_v6, %v2294_v7  ;;  %v3161_v12 = vpop.f32.mrb[108].mxu1 }
 0x290   :  { %v2110_v13 = vpop.f32.mrb[109].mxu1  ;;  %v2119_v17 = vadd.f32 %v3893_v10, %v3161_v12 }
 0x291   :  { %v2482_v14 = vrot.slane %v2481_v8, 2  ;;  %v2487_v16 = vmax.f32 %v2486_v11, %v2295_v9  ;;  %v2111_v18 = vadd.f32 %v3893_v10, %v2110_v13  ;;  %v3162_v19 = vpop.f32.mrb[110].mxu1 }
 0x292   :  { %v2113_v20 = vpop.f32.mrb[111].mxu1  ;;  %v2122_v26 = vadd.f32 %v3893_v10, %v3162_v19  ;;  %v2299_v29 = vmax.f32 %v2119_v17, 0.0 }
 0x293   :  { %v2483_v1 = vmax.f32 %v2481_v8, %v2482_v14  ;;  %v2297_v21 = vmax.f32 %v2111_v18, 0.0  ;;  %v2488_v22 = vmax.f32 %v2487_v16, %v2296_v15  ;;  %v2114_v23 = vadd.f32 %v3893_v10, %v2113_v20 }
 0x294   :  { %v2300_v33 = vmax.f32 %v2122_v26, 0.0 }
 0x295   :  { %v2484_v24 = vrot.slane %v2483_v1, 1  ;;  %v2489_v25 = vmax.f32 %v2488_v22, %v2297_v21  ;;  %v2298_v27 = vmax.f32 %v2114_v23, 0.0 }
 0x297   :  { %v2485_v28 = vmax.f32 %v2483_v1, %v2484_v24  ;;  %v2490_v30 = vmax.f32 %v2489_v25, %v2298_v27  ;;  %v3165_v31 = vpop.f32.mrb[112].mxu1 }
 0x298   :  { %v2126_v32 = vpop.f32.mrb[113].mxu1  ;;  %v2135_v40 = vadd.f32 %v3893_v10, %v3165_v31 }
 0x299   :  { %v2491_v34 = vmax.f32 %v2490_v30, %v2299_v29  ;;  %v2127_v35 = vadd.f32 %v3893_v10, %v2126_v32  ;;  %v3166_v36 = vpop.f32.mrb[114].mxu1  ;;  %v2558_v37 = vsel %vm2547_vm6, %v2485_v28, %v2557_v58 }
 0x29a   :  { %v2129_v38 = vpop.f32.mrb[115].mxu1  ;;  %v2138_v44 = vadd.f32 %v3893_v10, %v3166_v36  ;;  %v2303_v47 = vmax.f32 %v2135_v40, 0.0 }
 0x29b   :  { %v2492_v39 = vmax.f32 %v2491_v34, %v2300_v33  ;;  %v2130_v41 = vadd.f32 %v3893_v10, %v2129_v38  ;;  %v2301_v43 = vmax.f32 %v2127_v35, 0.0 }
 0x29c   :  { %v2304_v52 = vmax.f32 %v2138_v44, 0.0 }
 0x29d   :  { %v2493_v42 = vrot.slane %v2492_v39, 4  ;;  %v2302_v45 = vmax.f32 %v2130_v41, 0.0 }
 0x29f   :  { %v2494_v46 = vmax.f32 %v2492_v39, %v2493_v42  ;;  %v2499_v48 = vmax.f32 %v2301_v43, %v2302_v45  ;;  %v3169_v49 = vpop.f32.mrb[116].mxu1 }
 0x2a0   :  { %v2142_v50 = vpop.f32.mrb[117].mxu1  ;;  %v2151_v56 = vadd.f32 %v3893_v10, %v3169_v49 }
 0x2a1   :  { %v2495_v51 = vrot.slane %v2494_v46, 2  ;;  %v2500_v53 = vmax.f32 %v2499_v48, %v2303_v47  ;;  %v2143_v54 = vadd.f32 %v3893_v10, %v2142_v50  ;;  %v3170_v55 = vpop.f32.mrb[118].mxu1 }
 0x2a2   :  { %v2145_v57 = vpop.f32.mrb[119].mxu1  ;;  %v2154_v2 = vadd.f32 %v3893_v10, %v3170_v55  ;;  %v2307_v5 = vmax.f32 %v2151_v56, 0.0 }
 0x2a3   :  { %v2496_v58 = vmax.f32 %v2494_v46, %v2495_v51  ;;  %v2305_v59 = vmax.f32 %v2143_v54, 0.0  ;;  %v2501_v60 = vmax.f32 %v2500_v53, %v2304_v52  ;;  %v2146_v62 = vadd.f32 %v3893_v10, %v2145_v57 }
 0x2a4   :  { %v2308_v8 = vmax.f32 %v2154_v2, 0.0 }
 0x2a5   :  { %v2497_v63 = vrot.slane %v2496_v58, 1  ;;  %v2502_v0 = vmax.f32 %v2501_v60, %v2305_v59  ;;  %v2306_v3 = vmax.f32 %v2146_v62, 0.0 }
 0x2a7   :  { %v2498_v4 = vmax.f32 %v2496_v58, %v2497_v63  ;;  %v2503_v6 = vmax.f32 %v2502_v0, %v2306_v3  ;;  %v3173_v61 = vpop.f32.mrb[120].mxu1 }
 0x2a8   :  { %v2158_v7 = vpop.f32.mrb[121].mxu1  ;;  %v2167_v16 = vadd.f32 %v3893_v10, %v3173_v61 }
 0x2a9   :  { %v2504_v9 = vmax.f32 %v2503_v6, %v2307_v5  ;;  %v2159_v11 = vadd.f32 %v3893_v10, %v2158_v7  ;;  %v3174_v12 = vpop.f32.mrb[122].mxu1  ;;  %v2559_v13 = vsel %vm2549_vm7, %v2498_v4, %v2558_v37 }
 0x2aa   :  { %v2161_v14 = vpop.f32.mrb[123].mxu1  ;;  %v2170_v20 = vadd.f32 %v3893_v10, %v3174_v12  ;;  %v2311_v22 = vmax.f32 %v2167_v16, 0.0 }
 0x2ab   :  { %v2505_v15 = vmax.f32 %v2504_v9, %v2308_v8  ;;  %v2162_v18 = vadd.f32 %v3893_v10, %v2161_v14  ;;  %v2309_v17 = vmax.f32 %v2159_v11, 0.0 }
 0x2ac   :  { %v2312_v27 = vmax.f32 %v2170_v20, 0.0 }
 0x2ad   :  { %v2506_v19 = vrot.slane %v2505_v15, 4  ;;  %v2310_v1 = vmax.f32 %v2162_v18, 0.0 }
 0x2af   :  { %v2507_v21 = vmax.f32 %v2505_v15, %v2506_v19  ;;  %v2512_v23 = vmax.f32 %v2309_v17, %v2310_v1  ;;  %v3177_v24 = vpop.f32.mrb[124].mxu1 }
 0x2b0   :  { %v2174_v25 = vpop.f32.mrb[125].mxu1  ;;  %v2183_v31 = vadd.f32 %v3893_v10, %v3177_v24 }
 0x2b1   :  { %v2508_v26 = vrot.slane %v2507_v21, 2  ;;  %v2513_v28 = vmax.f32 %v2512_v23, %v2311_v22  ;;  %v2175_v29 = vadd.f32 %v3893_v10, %v2174_v25  ;;  %v3178_v30 = vpop.f32.mrb[126].mxu1 }
 0x2b2   :  { %v2177_v32 = vpop.f32.mrb[127].mxu1  ;;  %v2186_v39 = vadd.f32 %v3893_v10, %v3178_v30  ;;  %v2315_v42 = vmax.f32 %v2183_v31, 0.0 }
 0x2b3   :  { %v2509_v33 = vmax.f32 %v2507_v21, %v2508_v26  ;;  %v2313_v34 = vmax.f32 %v2175_v29, 0.0  ;;  %v2514_v35 = vmax.f32 %v2513_v28, %v2312_v27  ;;  %v2178_v36 = vadd.f32 %v3893_v10, %v2177_v32 }
 0x2b4   :  { %v2316_v44 = vmax.f32 %v2186_v39, 0.0 }
 0x2b5   :  { %v2510_v37 = vrot.slane %v2509_v33, 1  ;;  %v2515_v38 = vmax.f32 %v2514_v35, %v2313_v34  ;;  %v2314_v40 = vmax.f32 %v2178_v36, 0.0 }
 0x2b7   :  { %v2511_v41 = vmax.f32 %v2509_v33, %v2510_v37  ;;  %v2516_v43 = vmax.f32 %v2515_v38, %v2314_v40 }
 0x2b9   :  { %v2517_v45 = vmax.f32 %v2516_v43, %v2315_v42  ;;  %v2560_v46 = vsel %vm2551_vm8, %v2511_v41, %v2559_v13 }
 0x2bb   :  { %v2518_v47 = vmax.f32 %v2517_v45, %v2316_v44 }
 0x2bd   :  { %v2519_v48 = vrot.slane %v2518_v47, 4 }
 0x2bf   :  { %v2520_v49 = vmax.f32 %v2518_v47, %v2519_v48 }
 0x2c1   :  { %v2521_v50 = vrot.slane %v2520_v49, 2 }
 0x2c3   :  { %v2522_v51 = vmax.f32 %v2520_v49, %v2521_v50 }
 0x2c5   :  { %v2523_v52 = vrot.slane %v2522_v51, 1 }
 0x2c7   :  { %v2524_v53 = vmax.f32 %v2522_v51, %v2523_v52 }
 0x2c9   :  { %v2561_v10 = vsel %vm2553_vm9, %v2524_v53, %v2560_v46 }
 0x2ca   :  { %2565 = vst [vmem:[#allocation2 + $0x8] sm:$0xff] %v2561_v10 }
 0x2cb   :  { %3264 = shalt.err (!%p3261_p4)
}
 0x2cc   :  { %s3265_s6 = scalar_lea.hbm %s3952_s5, 256 }
 0x2cd   :  { %p3266_p5 = scmp.ne.s32.totalorder %s3952_s5, %s3265_s6  ;;  %p3269_p6 = scmp.lt.u32.totalorder %s3265_s6, %s3952_s5 }
 0x2cf   :  { %p3271_p7 = pnand %p3269_p6, %p3266_p5 }
 0x2d1   :  { %3274 = shalt.err (!%p3271_p7)
}
 0x2d2   :  { %s3278_s11 = smov 128   ;;  %s3279_s12 = smov 8  }
 0x2d3   :  { %2577 = dma.vmem_to_hbm [thread:$0]  %s2572_s28, 256, %s3952_s5, [#allocation3], %s3278_s11, %s3278_s11, %s3279_s12  }
 0x2d4   :  { %3275 = dma.done.wait [#allocation3], 256  }
 0x2d5   :  { %3276 = vsyncadd [#allocation3], 4294967040 }
 0x2d6   :  { %2581 = vsyncpa [#allocation3], 1 }

</bundles_post_ra>
